<compile_context>
chip_gen: v6e
topology: v6e:2x2x1
jax: 0.10.0
libtpu: 0.0.40
codegen_flags: <defaults>
</compile_context>

<pallas_src>
import jax
import jax.numpy as jnp
from jax.experimental import pallas as pl
from jax.experimental.pallas import tpu as pltpu


def _lintrans_kernel(x_ref, w_ref, b_ref, o_ref):
    """Fused: single affine transform + per-row min-max scale + L2 normalize."""
    x = x_ref[...].astype(jnp.float32)               # (tile, D_in)
    w = w_ref[...].astype(jnp.float32)               # (D_in, D_out)
    b = b_ref[...].astype(jnp.float32)               # (1, D_out)

    acc = jnp.dot(x, w, preferred_element_type=jnp.float32) + b

    # scale(): per-row min-max scaling (dim=1). NaN/inf for constant rows,
    # matching the torch reference's behavior.
    zmax = jnp.max(acc, axis=1, keepdims=True)
    zmin = jnp.min(acc, axis=1, keepdims=True)
    z = (acc - zmin) * pl.reciprocal(zmax - zmin, approx=False)

    # F.normalize(dim=1, p=2, eps=1e-12):  z / max(||z||, 1e-12)
    sumsq = jnp.sum(z * z, axis=1, keepdims=True)
    inv_norm = jax.lax.rsqrt(jnp.maximum(sumsq, 1e-24))   # == 1/max(sqrt(s),1e-12)
    o_ref[...] = (z * inv_norm).astype(o_ref.dtype)


def _round_up(x, m):
    return ((x + m - 1) // m) * m


def lintrans_forward(x, weights, biases, *, tile_rows=512):
    """x: (N, dims[0]); weights[i]: (dims[i], dims[i+1]); biases[i]: (1, dims[i+1])."""
    n_rows, d_in = x.shape

    # Fold the affine chain (no nonlinearity between layers) into one transform.
    w_eff = weights[0].astype(jnp.float32)
    b_eff = biases[0].astype(jnp.float32)
    for w, b in zip(weights[1:], biases[1:]):
        wf = w.astype(jnp.float32)
        b_eff = b_eff @ wf + b.astype(jnp.float32)
        w_eff = w_eff @ wf
    d_out = w_eff.shape[1]

    # Row tile: multiple of 8 (f32 sublane), capped at tile_rows; pad N so the
    # 1-D row grid divides evenly (padded rows are sliced off afterwards).
    tile = max(8, min(_round_up(tile_rows, 8), _round_up(n_rows, 8)))
    n_pad = _round_up(n_rows, tile)
    x_p = x if n_pad == n_rows else jnp.pad(x, ((0, n_pad - n_rows), (0, 0)))

    grid = (n_pad // tile,)
    flops = 2 * n_pad * d_in * d_out + 8 * n_pad * d_out
    bytes_accessed = 4 * (n_pad * d_in + d_in * d_out + d_out + n_pad * d_out)

    out = pl.pallas_call(
        _lintrans_kernel,
        out_shape=jax.ShapeDtypeStruct((n_pad, d_out), x.dtype),
        grid_spec=pl.GridSpec(
            grid=grid,
            in_specs=[
                pl.BlockSpec((tile, d_in), lambda i: (i, 0)),   # streamed rows
                pl.BlockSpec((d_in, d_out), lambda i: (0, 0)),  # resident weight
                pl.BlockSpec((1, d_out), lambda i: (0, 0)),     # resident bias
            ],
            out_specs=pl.BlockSpec((tile, d_out), lambda i: (i, 0)),
        ),
        compiler_params=pltpu.CompilerParams(
            dimension_semantics=("parallel",)),
        cost_estimate=pl.CostEstimate(
            flops=flops, transcendentals=2 * n_pad,
            bytes_accessed=bytes_accessed),
    )(x_p, w_eff, b_eff)

    return out[:n_rows] if n_pad != n_rows else out


def lintrans_reference(x, weights, biases):
    out = x.astype(jnp.float32)
    for w, b in zip(weights, biases):
        out = out @ w.astype(jnp.float32) + b.astype(jnp.float32)
    zmax = jnp.max(out, axis=1, keepdims=True)
    zmin = jnp.min(out, axis=1, keepdims=True)
    z = (out - zmin) / (zmax - zmin)
    norm = jnp.sqrt(jnp.sum(z * z, axis=1, keepdims=True))
    return z / jnp.maximum(norm, 1e-12)


if __name__ == "__main__":
    # LinTrans(layers=2, dims=[32, 64, 16]); input x: (1024, 32)
    layers = 2
    dims = [32, 64, 16]
    n_rows = 1024

    key = jax.random.PRNGKey(0)
    kx, *kws = jax.random.split(key, 1 + 2 * layers)

    x = jax.random.normal(kx, (n_rows, dims[0]), dtype=jnp.float32)

    weights, biases = [], []
    for i in range(layers):
        bound = 1.0 / (float(dims[i]) ** 0.5)
        # torch.nn.Linear-style uniform init; weight stored pre-transposed (D_in, D_out).
        w = jax.random.uniform(kws[2 * i], (dims[i], dims[i + 1]),
                               minval=-bound, maxval=bound, dtype=jnp.float32)
        b = jax.random.uniform(kws[2 * i + 1], (1, dims[i + 1]),
                               minval=-bound, maxval=bound, dtype=jnp.float32)
        weights.append(w)
        biases.append(b)

    out = lintrans_forward(x, weights, biases, tile_rows=512)
    out = jax.block_until_ready(out)

    ref = lintrans_reference(x, weights, biases)
    assert out.shape == (n_rows, dims[-1])
    assert jnp.allclose(out, ref, atol=1e-5, rtol=1e-4), "mismatch vs reference"

    print("KERNEL_OK")
</pallas_src>

<mosaic_0001>
module attributes {stable_mosaic.version = 11 : i64} {
  func.func @_lintrans_kernel(%arg0: i32, %arg1: memref<512x32xf32, #tpu.memory_space<vmem>>, %arg2: memref<32x16xf32, #tpu.memory_space<vmem>>, %arg3: memref<1x16xf32, #tpu.memory_space<vmem>>, %arg4: memref<512x16xf32, #tpu.memory_space<vmem>>) attributes {dimension_semantics = [#tpu.dimension_semantics<parallel>], iteration_bounds = array<i64: 2>, scalar_prefetch = 0 : i64, scratch_operands = 0 : i64, tpu.core_type = #tpu.core_type<tc>, window_params = [{transform_indices = @transform_0, window_bounds = array<i64: 512, 32>}, {pipeline_mode = #tpu.pipeline_mode<synchronous>, transform_indices = @transform_1, window_bounds = array<i64: 32, 16>}, {pipeline_mode = #tpu.pipeline_mode<synchronous>, transform_indices = @transform_2, window_bounds = array<i64: 1, 16>}, {transform_indices = @transform_3, window_bounds = array<i64: 512, 16>}]} {
    %c0 = arith.constant 0 : index
    %c0_0 = arith.constant 0 : index
    %0 = vector.load %arg1[%c0, %c0_0] : memref<512x32xf32, #tpu.memory_space<vmem>>, vector<512x32xf32>
    %c0_1 = arith.constant 0 : index
    %c0_2 = arith.constant 0 : index
    %1 = vector.load %arg2[%c0_1, %c0_2] : memref<32x16xf32, #tpu.memory_space<vmem>>, vector<32x16xf32>
    %c0_3 = arith.constant 0 : index
    %c0_4 = arith.constant 0 : index
    %2 = vector.load %arg3[%c0_3, %c0_4] : memref<1x16xf32, #tpu.memory_space<vmem>>, vector<1x16xf32>
    %cst = arith.constant dense<0.000000e+00> : vector<512x16xf32>
    %3 = tpu.matmul %0, %1, %cst {dimension_numbers = #tpu.dot_dimension_numbers<[1], [0], [0], [1], [0, 0, 1, 1], [], []>} : vector<512x32xf32>, vector<32x16xf32>, vector<512x16xf32> -> vector<512x16xf32>
    %4 = vector.broadcast %2 : vector<1x16xf32> to vector<512x16xf32>
    %5 = arith.addf %3, %4 : vector<512x16xf32>
    %cst_5 = arith.constant dense<0xFF800000> : vector<512xf32>
    %6 = vector.multi_reduction <maximumf>, %5, %cst_5 [1] : vector<512x16xf32> to vector<512xf32>
    %7 = vector.shape_cast %6 : vector<512xf32> to vector<512x1xf32>
    %cst_6 = arith.constant dense<0x7F800000> : vector<512xf32>
    %8 = vector.multi_reduction <minimumf>, %5, %cst_6 [1] : vector<512x16xf32> to vector<512xf32>
    %9 = vector.shape_cast %8 : vector<512xf32> to vector<512x1xf32>
    %10 = vector.broadcast %9 : vector<512x1xf32> to vector<512x16xf32>
    %11 = arith.subf %5, %10 : vector<512x16xf32>
    %12 = arith.subf %7, %9 : vector<512x1xf32>
    %13 = tpu.reciprocal %12 : vector<512x1xf32> -> vector<512x1xf32>
    %14 = vector.broadcast %13 : vector<512x1xf32> to vector<512x16xf32>
    %15 = arith.mulf %11, %14 : vector<512x16xf32>
    %16 = arith.mulf %15, %15 : vector<512x16xf32>
    %cst_7 = arith.constant dense<0.000000e+00> : vector<512xf32>
    %17 = vector.multi_reduction <add>, %16, %cst_7 [1] : vector<512x16xf32> to vector<512xf32>
    %18 = vector.shape_cast %17 : vector<512xf32> to vector<512x1xf32>
    %cst_8 = arith.constant 1.000000e-24 : f32
    %19 = vector.broadcast %cst_8 : f32 to vector<512x1xf32>
    %20 = arith.maximumf %18, %19 : vector<512x1xf32>
    %21 = math.rsqrt %20 : vector<512x1xf32>
    %22 = vector.broadcast %21 : vector<512x1xf32> to vector<512x16xf32>
    %23 = arith.mulf %15, %22 : vector<512x16xf32>
    %c0_9 = arith.constant 0 : index
    %c0_10 = arith.constant 0 : index
    %24 = vector.load %arg4[%c0_9, %c0_10] : memref<512x16xf32, #tpu.memory_space<vmem>>, vector<512x16xf32>
    tpu.vector_store %arg4[%c0_9, %c0_10], %23 {strides = array<i32>} : memref<512x16xf32, #tpu.memory_space<vmem>>, vector<512x16xf32>,
    return
  }
  func.func @transform_0(%arg0: i32) -> (i32, i32) {
    %c0_i32 = arith.constant 0 : i32
    %c0_i32_0 = arith.constant 0 : i32
    return %arg0, %c0_i32 : i32, i32
  }
  func.func @transform_1(%arg0: i32) -> (i32, i32) {
    %c0_i32 = arith.constant 0 : i32
    %c0_i32_0 = arith.constant 0 : i32
    %c0_i32_1 = arith.constant 0 : i32
    return %c0_i32, %c0_i32_0 : i32, i32
  }
  func.func @transform_2(%arg0: i32) -> (i32, i32) {
    %c0_i32 = arith.constant 0 : i32
    %c0_i32_0 = arith.constant 0 : i32
    %c0_i32_1 = arith.constant 0 : i32
    return %c0_i32, %c0_i32_0 : i32, i32
  }
  func.func @transform_3(%arg0: i32) -> (i32, i32) {
    %c0_i32 = arith.constant 0 : i32
    %c0_i32_0 = arith.constant 0 : i32
    return %arg0, %c0_i32 : i32, i32
  }
}

</mosaic_0001>

<bundles_post_ra>
// kernel: tpu_custom_call.1
= control target key start
LH: loop header
LB: loop body
LE: loop exit
PB: predicated region body
PF: predicated region fallthrough
CT: control target
= control target key end

     0   :  { %s2585_s12 = smov 0   ;;  %s3942_s0 = inlined_call_operand.vmem [shape: f32[1024,32], index: 0, kind: input, shape index: {}]   ;;  %s3943_s1 = inlined_call_operand.vmem [shape: f32[32,16], index: 1, kind: input, shape index: {}]   ;;  %s3944_s2 = inlined_call_operand.vmem [shape: f32[1,16], index: 2, kind: input, shape index: {}]   ;;  %s3945_s3 = inlined_call_operand.vmem [shape: f32[1024,16], index: 3, kind: output, shape index: {}]  }
   0x1 LB: > { %s2036_s13 = sadd.s32 4294967295, %s2563_s12   ;;  %p2040_p0 = scmp.ge.s32.totalorder %s2563_s12, 1  ;;  %s2563_s12 = sphi %s2585_s12, %s13_s12  }
   0x2   : > { %p138_p1 = scmp.lt.s32.totalorder %s2563_s12, 3 }
   0x4   : > { %p139_p2 = pnand %p2040_p0, %p138_p1 }
   0x6   : > { %142 = sbr.rel (%p139_p2) target bundleno = 786 (0x312), region = 32 }
   0xb   : > { %v241_v0 = vld [vmem:[%s3943_s1 + $0x18] sm:$0xff]  ;;  %v240_v1 = vld [vmem:[%s3943_s1 + $0x10] sm:$0xff]  ;;  %s2041_s18 = sshll.u32 %s2036_s13, 6  ;;  %v239_v2 = vld [vmem:[%s3943_s1 + $0x8] sm:$0xff]  ;;  %vm249_vm0 = vcmask 261120   ;;  %vm827_vm1 = vcmask 130048  }
   0xc   : > { %2180 = vmatprep.subr.mxu0 %v241_v0  ;;  %2284 = vmatprep.subr.mxu1 %v241_v0  ;;  %p163_p3 = scmp.lt.s32.totalorder %s2041_s18, 127  ;;  %v238_v3 = vld [vmem:[%s3943_s1] sm:$0xff] }
   0xd   : > { %2181 = vmatpush3.msra.mxu0 %v241_v0  ;;  %2288 = vmatpush3.msra.mxu1 %v241_v0 }
   0xe   : > { %2182 = vmatprep.subr.mxu0 %v240_v1  ;;  %2285 = vmatprep.subr.mxu1 %v240_v1  ;;  %s4085_s18 = smov (!%p163_p3, %s2041_s18), 127 }
   0xf   : > { %2183 = vmatpush3.msra.mxu0 %v240_v1  ;;  %2289 = vmatpush3.msra.mxu1 %v240_v1  ;;  %s2042_s23 = sshll.u32 %s4085_s18, 3 }
  0x10   : > { %2184 = vmatprep.subr.mxu0 %v239_v2  ;;  %2286 = vmatprep.subr.mxu1 %v239_v2  ;;  %s2613_s26 = scalar_lea.vmem %s3942_s0, %s2042_s23  ;;  %s3741_s6 = scalar_lea.vmem %s3945_s3, %s2042_s23 }
  0x11   : > { %2185 = vmatpush3.msra.mxu0 %v239_v2  ;;  %2290 = vmatpush3.msra.mxu1 %v239_v2  ;;  %v174_v4 = vld [vmem:[%s2613_s26] sm:$0xff]  ;;  %v175_v6 = vld [vmem:[%s2613_s26 + $0x8] sm:$0xff]  ;;  %v176_v8 = vld [vmem:[%s2613_s26 + $0x10] sm:$0xff] }
  0x12   : > { %2186 = vmatprep.subr.mxu0 %v238_v3  ;;  %2287 = vmatprep.subr.mxu1 %v238_v3  ;;  %v206_v5 = vld [vmem:[%s2613_s26 + $0x100] sm:$0xff]  ;;  %v207_v7 = vld [vmem:[%s2613_s26 + $0x108] sm:$0xff]  ;;  %v208_v9 = vld [vmem:[%s2613_s26 + $0x110] sm:$0xff] }
  0x13   : > { %2187 = vmatpush3.msra.mxu0 %v238_v3  ;;  %2291 = vmatpush3.msra.mxu1 %v238_v3  ;;  %v177_v10 = vld [vmem:[%s2613_s26 + $0x18] sm:$0xff]  ;;  %v178_v12 = vld [vmem:[%s2613_s26 + $0x20] sm:$0xff]  ;;  %v179_v14 = vld [vmem:[%s2613_s26 + $0x28] sm:$0xff] }
  0x14   : > { %2188 = vmatprep.mubr.msk.f32.mxu0 %vm249_vm0, %v174_v4  ;;  %2236 = vmatprep.mubr.msk.f32.mxu1 %vm249_vm0, %v206_v5  ;;  %v209_v11 = vld [vmem:[%s2613_s26 + $0x118] sm:$0xff]  ;;  %v210_v13 = vld [vmem:[%s2613_s26 + $0x120] sm:$0xff]  ;;  %v211_v15 = vld [vmem:[%s2613_s26 + $0x128] sm:$0xff] }
  0x15   : > { %2189 = vmatmul.mubr.msk.f32.vlgmr.msra.gmra.mxu0 %vm249_vm0, %v175_v6  ;;  %2237 = vmatmul.mubr.msk.f32.vlgmr.msra.gmra.mxu1 %vm249_vm0, %v207_v7  ;;  %v180_v16 = vld [vmem:[%s2613_s26 + $0x30] sm:$0xff]  ;;  %v181_v18 = vld [vmem:[%s2613_s26 + $0x38] sm:$0xff]  ;;  %v182_v20 = vld [vmem:[%s2613_s26 + $0x40] sm:$0xff] }
  0x16   : > { %2191 = vmatprep.mubr.msk.f32.mxu0 %vm249_vm0, %v176_v8  ;;  %2239 = vmatprep.mubr.msk.f32.mxu1 %vm249_vm0, %v208_v9  ;;  %v212_v17 = vld [vmem:[%s2613_s26 + $0x130] sm:$0xff]  ;;  %v213_v19 = vld [vmem:[%s2613_s26 + $0x138] sm:$0xff]  ;;  %v214_v21 = vld [vmem:[%s2613_s26 + $0x140] sm:$0xff] }
  0x17   : > { %v183_v22 = vld [vmem:[%s2613_s26 + $0x48] sm:$0xff]  ;;  %v184_v24 = vld [vmem:[%s2613_s26 + $0x50] sm:$0xff]  ;;  %v185_v26 = vld [vmem:[%s2613_s26 + $0x58] sm:$0xff] }
  0x18   : > { %v215_v23 = vld [vmem:[%s2613_s26 + $0x148] sm:$0xff]  ;;  %v216_v25 = vld [vmem:[%s2613_s26 + $0x150] sm:$0xff]  ;;  %v217_v27 = vld [vmem:[%s2613_s26 + $0x158] sm:$0xff] }
  0x19   : > { %2192 = vmatmul.mubr.msk.f32.gmra.mxu0 %vm249_vm0, %v177_v10  ;;  %2240 = vmatmul.mubr.msk.f32.gmra.mxu1 %vm249_vm0, %v209_v11  ;;  %v186_v28 = vld [vmem:[%s2613_s26 + $0x60] sm:$0xff]  ;;  %v187_v30 = vld [vmem:[%s2613_s26 + $0x68] sm:$0xff]  ;;  %v188_v32 = vld [vmem:[%s2613_s26 + $0x70] sm:$0xff] }
  0x1a   : > { %2194 = vmatprep.mubr.msk.f32.mxu0 %vm249_vm0, %v178_v12  ;;  %2242 = vmatprep.mubr.msk.f32.mxu1 %vm249_vm0, %v210_v13  ;;  %v218_v29 = vld [vmem:[%s2613_s26 + $0x160] sm:$0xff]  ;;  %v219_v31 = vld [vmem:[%s2613_s26 + $0x168] sm:$0xff]  ;;  %v220_v33 = vld [vmem:[%s2613_s26 + $0x170] sm:$0xff] }
  0x1b   : > { %v189_v34 = vld [vmem:[%s2613_s26 + $0x78] sm:$0xff]  ;;  %v190_v36 = vld [vmem:[%s2613_s26 + $0x80] sm:$0xff]  ;;  %v191_v38 = vld [vmem:[%s2613_s26 + $0x88] sm:$0xff] }
  0x1c   : > { %v221_v35 = vld [vmem:[%s2613_s26 + $0x178] sm:$0xff]  ;;  %v222_v37 = vld [vmem:[%s2613_s26 + $0x180] sm:$0xff]  ;;  %v223_v39 = vld [vmem:[%s2613_s26 + $0x188] sm:$0xff] }
  0x1d   : > { %2195 = vmatmul.mubr.msk.f32.gmra.mxu0 %vm249_vm0, %v179_v14  ;;  %2243 = vmatmul.mubr.msk.f32.gmra.mxu1 %vm249_vm0, %v211_v15  ;;  %v192_v40 = vld [vmem:[%s2613_s26 + $0x90] sm:$0xff]  ;;  %v193_v42 = vld [vmem:[%s2613_s26 + $0x98] sm:$0xff]  ;;  %v194_v44 = vld [vmem:[%s2613_s26 + $0xa0] sm:$0xff] }
  0x1e   : > { %2197 = vmatprep.mubr.msk.f32.mxu0 %vm249_vm0, %v180_v16  ;;  %2245 = vmatprep.mubr.msk.f32.mxu1 %vm249_vm0, %v212_v17  ;;  %v224_v41 = vld [vmem:[%s2613_s26 + $0x190] sm:$0xff]  ;;  %v225_v43 = vld [vmem:[%s2613_s26 + $0x198] sm:$0xff]  ;;  %v226_v45 = vld [vmem:[%s2613_s26 + $0x1a0] sm:$0xff] }
  0x1f   : > { %v195_v46 = vld [vmem:[%s2613_s26 + $0xa8] sm:$0xff]  ;;  %v196_v48 = vld [vmem:[%s2613_s26 + $0xb0] sm:$0xff]  ;;  %v197_v50 = vld [vmem:[%s2613_s26 + $0xb8] sm:$0xff] }
  0x20   : > { %v227_v47 = vld [vmem:[%s2613_s26 + $0x1a8] sm:$0xff]  ;;  %v228_v49 = vld [vmem:[%s2613_s26 + $0x1b0] sm:$0xff]  ;;  %v229_v51 = vld [vmem:[%s2613_s26 + $0x1b8] sm:$0xff] }
  0x21   : > { %2198 = vmatmul.mubr.msk.f32.gmra.mxu0 %vm249_vm0, %v181_v18  ;;  %2246 = vmatmul.mubr.msk.f32.gmra.mxu1 %vm249_vm0, %v213_v19  ;;  %v198_v52 = vld [vmem:[%s2613_s26 + $0xc0] sm:$0xff]  ;;  %v199_v54 = vld [vmem:[%s2613_s26 + $0xc8] sm:$0xff]  ;;  %v200_v56 = vld [vmem:[%s2613_s26 + $0xd0] sm:$0xff] }
  0x22   : > { %2200 = vmatprep.mubr.msk.f32.mxu0 %vm249_vm0, %v182_v20  ;;  %2248 = vmatprep.mubr.msk.f32.mxu1 %vm249_vm0, %v214_v21  ;;  %v230_v53 = vld [vmem:[%s2613_s26 + $0x1c0] sm:$0xff]  ;;  %v231_v55 = vld [vmem:[%s2613_s26 + $0x1c8] sm:$0xff]  ;;  %v201_v57 = vld [vmem:[%s2613_s26 + $0xd8] sm:$0xff] }
  0x23   : > { %v232_v58 = vld [vmem:[%s2613_s26 + $0x1d0] sm:$0xff]  ;;  %v233_v59 = vld [vmem:[%s2613_s26 + $0x1d8] sm:$0xff]  ;;  %v202_v60 = vld [vmem:[%s2613_s26 + $0xe0] sm:$0xff] }
  0x24   : > { %v203_v61 = vld [vmem:[%s2613_s26 + $0xe8] sm:$0xff]  ;;  %v234_v62 = vld [vmem:[%s2613_s26 + $0x1e0] sm:$0xff]  ;;  %v204_v0 = vld [vmem:[%s2613_s26 + $0xf0] sm:$0xff] }
  0x25   : > { %2201 = vmatmul.mubr.msk.f32.gmra.mxu0 %vm249_vm0, %v183_v22  ;;  %2249 = vmatmul.mubr.msk.f32.gmra.mxu1 %vm249_vm0, %v215_v23  ;;  %v235_v63 = vld [vmem:[%s2613_s26 + $0x1e8] sm:$0xff]  ;;  %v205_v1 = vld [vmem:[%s2613_s26 + $0xf8] sm:$0xff]  ;;  %v236_v2 = vld [vmem:[%s2613_s26 + $0x1f0] sm:$0xff] }
  0x26   : > { %2203 = vmatprep.mubr.msk.f32.mxu0 %vm249_vm0, %v184_v24  ;;  %2251 = vmatprep.mubr.msk.f32.mxu1 %vm249_vm0, %v216_v25  ;;  %v237_v3 = vld [vmem:[%s2613_s26 + $0x1f8] sm:$0xff]  ;;  %v2746_v4 = vld [vmem:[%s3944_s2] ss:$0 sm:$0xff] }
  0x29   : > { %2204 = vmatmul.mubr.msk.f32.gmra.mxu0 %vm249_vm0, %v185_v26  ;;  %2252 = vmatmul.mubr.msk.f32.gmra.mxu1 %vm249_vm0, %v217_v27 }
  0x2a   : > { %2206 = vmatprep.mubr.msk.f32.mxu0 %vm249_vm0, %v186_v28  ;;  %2254 = vmatprep.mubr.msk.f32.mxu1 %vm249_vm0, %v218_v29 }
  0x2d   : > { %2207 = vmatmul.mubr.msk.f32.gmra.mxu0 %vm249_vm0, %v187_v30  ;;  %2255 = vmatmul.mubr.msk.f32.gmra.mxu1 %vm249_vm0, %v219_v31 }
  0x2e   : > { %2209 = vmatprep.mubr.msk.f32.mxu0 %vm249_vm0, %v188_v32  ;;  %2257 = vmatprep.mubr.msk.f32.mxu1 %vm249_vm0, %v220_v33 }
  0x31   : > { %2210 = vmatmul.mubr.msk.f32.gmra.mxu0 %vm249_vm0, %v189_v34  ;;  %2258 = vmatmul.mubr.msk.f32.gmra.mxu1 %vm249_vm0, %v221_v35 }
  0x32   : > { %2212 = vmatprep.mubr.msk.f32.mxu0 %vm249_vm0, %v190_v36  ;;  %2260 = vmatprep.mubr.msk.f32.mxu1 %vm249_vm0, %v222_v37 }
  0x35   : > { %2213 = vmatmul.mubr.msk.f32.gmra.mxu0 %vm249_vm0, %v191_v38  ;;  %2261 = vmatmul.mubr.msk.f32.gmra.mxu1 %vm249_vm0, %v223_v39 }
  0x36   : > { %2215 = vmatprep.mubr.msk.f32.mxu0 %vm249_vm0, %v192_v40  ;;  %2263 = vmatprep.mubr.msk.f32.mxu1 %vm249_vm0, %v224_v41 }
  0x39   : > { %2216 = vmatmul.mubr.msk.f32.gmra.mxu0 %vm249_vm0, %v193_v42  ;;  %2264 = vmatmul.mubr.msk.f32.gmra.mxu1 %vm249_vm0, %v225_v43 }
  0x3a   : > { %2218 = vmatprep.mubr.msk.f32.mxu0 %vm249_vm0, %v194_v44  ;;  %2266 = vmatprep.mubr.msk.f32.mxu1 %vm249_vm0, %v226_v45 }
  0x3d   : > { %2219 = vmatmul.mubr.msk.f32.gmra.mxu0 %vm249_vm0, %v195_v46  ;;  %2267 = vmatmul.mubr.msk.f32.gmra.mxu1 %vm249_vm0, %v227_v47 }
  0x3e   : > { %2221 = vmatprep.mubr.msk.f32.mxu0 %vm249_vm0, %v196_v48  ;;  %2269 = vmatprep.mubr.msk.f32.mxu1 %vm249_vm0, %v228_v49 }
  0x41   : > { %2222 = vmatmul.mubr.msk.f32.gmra.mxu0 %vm249_vm0, %v197_v50  ;;  %2270 = vmatmul.mubr.msk.f32.gmra.mxu1 %vm249_vm0, %v229_v51 }
  0x42   : > { %2224 = vmatprep.mubr.msk.f32.mxu0 %vm249_vm0, %v198_v52  ;;  %2272 = vmatprep.mubr.msk.f32.mxu1 %vm249_vm0, %v230_v53 }
  0x45   : > { %2225 = vmatmul.mubr.msk.f32.gmra.mxu0 %vm249_vm0, %v199_v54  ;;  %2273 = vmatmul.mubr.msk.f32.gmra.mxu1 %vm249_vm0, %v231_v55 }
  0x46   : > { %2227 = vmatprep.mubr.msk.f32.mxu0 %vm249_vm0, %v200_v56  ;;  %2275 = vmatprep.mubr.msk.f32.mxu1 %vm249_vm0, %v232_v58 }
  0x49   : > { %2228 = vmatmul.mubr.msk.f32.gmra.mxu0 %vm249_vm0, %v201_v57  ;;  %2276 = vmatmul.mubr.msk.f32.gmra.mxu1 %vm249_vm0, %v233_v59 }
  0x4a   : > { %2230 = vmatprep.mubr.msk.f32.mxu0 %vm249_vm0, %v202_v60  ;;  %2278 = vmatprep.mubr.msk.f32.mxu1 %vm249_vm0, %v234_v62 }
  0x4d   : > { %2231 = vmatmul.mubr.msk.f32.gmra.mxu0 %vm249_vm0, %v203_v61  ;;  %2279 = vmatmul.mubr.msk.f32.gmra.mxu1 %vm249_vm0, %v235_v63 }
  0x4e   : > { %2233 = vmatprep.mubr.msk.f32.mxu0 %vm249_vm0, %v204_v0  ;;  %2281 = vmatprep.mubr.msk.f32.mxu1 %vm249_vm0, %v236_v2 }
  0x51   : > { %2234 = vmatmul.mubr.msk.f32.gmra.mxu0 %vm249_vm0, %v205_v1  ;;  %2282 = vmatmul.mubr.msk.f32.gmra.mxu1 %vm249_vm0, %v237_v3 }
  0xd5   : > { %v2190_v5 = vpop.f32.mrf.mxu0  ;;  %v2238_v6 = vpop.f32.mrf.mxu1 }
  0xd6   : > { %v2749_v7 = vadd.f32 %v2190_v5, %v2746_v4  ;;  %v2752_v8 = vadd.f32 %v2238_v6, %v2746_v4 }
  0xd7   : > { %v508_v9 = vpop.f32.mrf.mxu0  ;;  %v668_v13 = vpop.f32.mrf.mxu1 }
  0xd8   : > { %v2755_v10 = vadd.f32 %v2746_v4, %v508_v9  ;;  %v927_v11 = vsel %vm827_vm1, %v2752_v8, -inf  ;;  %v831_v12 = vsel %vm827_vm1, %v2749_v7, -inf  ;;  %v2762_v14 = vadd.f32 %v2746_v4, %v668_v13 }
  0xd9   : > { %928 = vmax.xlane.f32.xlu1 %v927_v11  ;;  %832 = vmax.xlane.f32.xlu0 %v831_v12  ;;  %v1023_v15 = vsel %vm827_vm1, %v2749_v7, inf  ;;  %v2193_v17 = vpop.f32.mrf.mxu0  ;;  %v1119_v19 = vsel %vm827_vm1, %v2752_v8, inf  ;;  %v2241_v21 = vpop.f32.mrf.mxu1 }
  0xda   : > { %v828_v16 = vsel %vm827_vm1, %v2755_v10, -inf  ;;  %v2769_v18 = vadd.f32 %v2193_v17, %v2746_v4  ;;  %v924_v20 = vsel %vm827_vm1, %v2762_v14, -inf  ;;  %v2776_v22 = vadd.f32 %v2241_v21, %v2746_v4 }
  0xdb   : > { %v1020_v24 = vsel %vm827_vm1, %v2755_v10, inf  ;;  %v678_v25 = vpop.f32.mrf.mxu1  ;;  %v1116_v28 = vsel %vm827_vm1, %v2762_v14, inf  ;;  %v518_v29 = vpop.f32.mrf.mxu0 }
  0xdc   : > { %v837_v23 = vsel %vm827_vm1, %v2769_v18, -inf  ;;  %v933_v26 = vsel %vm827_vm1, %v2776_v22, -inf  ;;  %v2785_v27 = vadd.f32 %v2746_v4, %v678_v25  ;;  %v2790_v30 = vadd.f32 %v2746_v4, %v518_v29 }
  0xdd   : > { %1024 = vmin.xlane.f32.xlu1 %v1023_v15  ;;  %829 = vmax.xlane.f32.xlu0 %v828_v16  ;;  %v1029_v31 = vsel %vm827_vm1, %v2769_v18, inf  ;;  %v2196_v33 = vpop.f32.mrf.mxu0  ;;  %v1125_v34 = vsel %vm827_vm1, %v2776_v22, inf  ;;  %v2244_v37 = vpop.f32.mrf.mxu1 }
  0xde   : > { %v930_v32 = vsel %vm827_vm1, %v2785_v27, -inf  ;;  %v1026_v35 = vsel %vm827_vm1, %v2790_v30, inf  ;;  %v2801_v38 = vadd.f32 %v2196_v33, %v2746_v4  ;;  %v834_v40 = vsel %vm827_vm1, %v2790_v30, -inf }
  0xdf   : > { %v528_v36 = vpop.f32.mrf.mxu0  ;;  %v1122_v41 = vsel %vm827_vm1, %v2785_v27, inf  ;;  %v688_v42 = vpop.f32.mrf.mxu1  ;;  %v2811_v43 = vadd.f32 %v2244_v37, %v2746_v4 }
  0xe0   : > { %v2804_v39 = vadd.f32 %v2746_v4, %v528_v36  ;;  %v2814_v44 = vadd.f32 %v2746_v4, %v688_v42  ;;  %v843_v45 = vsel %vm827_vm1, %v2801_v38, -inf  ;;  %v1035_v50 = vsel %vm827_vm1, %v2801_v38, inf }
  0xe1   : > { %1120 = vmin.xlane.f32.xlu1 %v1119_v19  ;;  %925 = vmax.xlane.f32.xlu0 %v924_v20  ;;  %v939_v47 = vsel %vm827_vm1, %v2811_v43, -inf  ;;  %v2199_v49 = vpop.f32.mrf.mxu0  ;;  %v2247_v53 = vpop.f32.mrf.mxu1  ;;  %v1131_v56 = vsel %vm827_vm1, %v2811_v43, inf }
  0xe2   : > { %v840_v46 = vsel %vm827_vm1, %v2804_v39, -inf  ;;  %v936_v48 = vsel %vm827_vm1, %v2814_v44, -inf  ;;  %v1032_v51 = vsel %vm827_vm1, %v2804_v39, inf  ;;  %v2829_v54 = vadd.f32 %v2199_v49, %v2746_v4 }
  0xe3   : > { %v538_v52 = vpop.f32.mrf.mxu0  ;;  %v1128_v57 = vsel %vm827_vm1, %v2814_v44, inf  ;;  %v698_v58 = vpop.f32.mrf.mxu1  ;;  %v2839_v59 = vadd.f32 %v2247_v53, %v2746_v4 }
  0xe4   : > { %v2832_v55 = vadd.f32 %v2746_v4, %v538_v52  ;;  %v2842_v60 = vadd.f32 %v2746_v4, %v698_v58  ;;  %v849_v61 = vsel %vm827_vm1, %v2829_v54, -inf  ;;  %v1041_v2 = vsel %vm827_vm1, %v2829_v54, inf }
  0xe5   : > { %838 = vmax.xlane.f32.xlu1 %v837_v23  ;;  %1021 = vmin.xlane.f32.xlu0 %v1020_v24  ;;  %v945_v63 = vsel %vm827_vm1, %v2839_v59, -inf  ;;  %v2202_v1 = vpop.f32.mrf.mxu0  ;;  %v2250_v6 = vpop.f32.mrf.mxu1  ;;  %v1137_v12 = vsel %vm827_vm1, %v2839_v59, inf }
  0xe6   : > { %v846_v62 = vsel %vm827_vm1, %v2832_v55, -inf  ;;  %v942_v0 = vsel %vm827_vm1, %v2842_v60, -inf  ;;  %v1038_v3 = vsel %vm827_vm1, %v2832_v55, inf  ;;  %v2857_v9 = vadd.f32 %v2202_v1, %v2746_v4 }
  0xe7   : > { %v548_v5 = vpop.f32.mrf.mxu0  ;;  %v1134_v13 = vsel %vm827_vm1, %v2842_v60, inf  ;;  %v708_v15 = vpop.f32.mrf.mxu1  ;;  %v2867_v16 = vadd.f32 %v2250_v6, %v2746_v4 }
  0xe8   : > { %v2860_v11 = vadd.f32 %v2746_v4, %v548_v5  ;;  %v2870_v17 = vadd.f32 %v2746_v4, %v708_v15  ;;  %v855_v19 = vsel %vm827_vm1, %v2857_v9, -inf  ;;  %v1047_v25 = vsel %vm827_vm1, %v2857_v9, inf }
  0xe9   : > { %934 = vmax.xlane.f32.xlu1 %v933_v26  ;;  %1117 = vmin.xlane.f32.xlu0 %v1116_v28  ;;  %v951_v21 = vsel %vm827_vm1, %v2867_v16, -inf  ;;  %v2205_v24 = vpop.f32.mrf.mxu0  ;;  %v2253_v29 = vpop.f32.mrf.mxu1  ;;  %v1143_v33 = vsel %vm827_vm1, %v2867_v16, inf }
  0xea   : > { %v852_v20 = vsel %vm827_vm1, %v2860_v11, -inf  ;;  %v948_v23 = vsel %vm827_vm1, %v2870_v17, -inf  ;;  %v1044_v26 = vsel %vm827_vm1, %v2860_v11, inf  ;;  %v2895_v36 = vadd.f32 %v2253_v29, %v2746_v4 }
  0xeb   : > { %v558_v28 = vpop.f32.mrf.mxu0 }
  0xec   : > { %v957_v42 = vsel %vm827_vm1, %v2895_v36, -inf  ;;  %v1149_v53 = vsel %vm827_vm1, %v2895_v36, inf }
  0xed   : > { %1030 = vmin.xlane.f32.xlu1 %v1029_v31  ;;  %931 = vmax.xlane.f32.xlu0 %v930_v32  ;;  %v2885_v31 = vadd.f32 %v2205_v24, %v2746_v4  ;;  %v2888_v32 = vadd.f32 %v2746_v4, %v558_v28 }
  0xf1   : > { %1126 = vmin.xlane.f32.xlu1 %v1125_v34  ;;  %1027 = vmin.xlane.f32.xlu0 %v1026_v35  ;;  %v1140_v34 = vsel %vm827_vm1, %v2870_v17, inf  ;;  %v718_v35 = vpop.f32.mrf.mxu1 }
  0xf2   : > { %v2898_v37 = vadd.f32 %v2746_v4, %v718_v35 }
  0xf5   : > { %835 = vmax.xlane.f32.xlu1 %v834_v40  ;;  %1123 = vmin.xlane.f32.xlu0 %v1122_v41  ;;  %v861_v40 = vsel %vm827_vm1, %v2885_v31, -inf  ;;  %v858_v41 = vsel %vm827_vm1, %v2888_v32, -inf }
  0xf9   : > { %844 = vmax.xlane.f32.xlu1 %v843_v45  ;;  %841 = vmax.xlane.f32.xlu0 %v840_v46  ;;  %v954_v45 = vsel %vm827_vm1, %v2898_v37, -inf  ;;  %v2208_v46 = vpop.f32.mrf.mxu0 }
  0xfb   : > { %v568_v49 = vpop.f32.mrf.mxu0 }
  0xfc   : > { %v2916_v52 = vadd.f32 %v2746_v4, %v568_v49 }
  0xfd   : > { %940 = vmax.xlane.f32.xlu1 %v939_v47  ;;  %937 = vmax.xlane.f32.xlu0 %v936_v48  ;;  %v1053_v47 = vsel %vm827_vm1, %v2885_v31, inf  ;;  %v1050_v48 = vsel %vm827_vm1, %v2888_v32, inf }
  0xfe   : > { %v1056_v5 = vsel %vm827_vm1, %v2916_v52, inf }
 0x101   : > { %1036 = vmin.xlane.f32.xlu1 %v1035_v50  ;;  %1033 = vmin.xlane.f32.xlu0 %v1032_v51  ;;  %v2256_v50 = vpop.f32.mrf.mxu1  ;;  %v2913_v51 = vadd.f32 %v2208_v46, %v2746_v4 }
 0x102   : > { %v2923_v58 = vadd.f32 %v2256_v50, %v2746_v4 }
 0x105   : > { %1132 = vmin.xlane.f32.xlu1 %v1131_v56  ;;  %1129 = vmin.xlane.f32.xlu0 %v1128_v57  ;;  %v1146_v56 = vsel %vm827_vm1, %v2898_v37, inf  ;;  %v728_v57 = vpop.f32.mrf.mxu1 }
 0x109   : > { %850 = vmax.xlane.f32.xlu1 %v849_v61  ;;  %847 = vmax.xlane.f32.xlu0 %v846_v62  ;;  %v2926_v61 = vadd.f32 %v2746_v4, %v728_v57  ;;  %v867_v62 = vsel %vm827_vm1, %v2913_v51, -inf }
 0x10b   : > { %v960_v1 = vsel %vm827_vm1, %v2926_v61, -inf }
 0x10d   : > { %946 = vmax.xlane.f32.xlu1 %v945_v63  ;;  %943 = vmax.xlane.f32.xlu0 %v942_v0  ;;  %v864_v63 = vsel %vm827_vm1, %v2916_v52, -inf  ;;  %v963_v0 = vsel %vm827_vm1, %v2923_v58, -inf }
 0x111   : > { %1042 = vmin.xlane.f32.xlu1 %v1041_v2  ;;  %1039 = vmin.xlane.f32.xlu0 %v1038_v3  ;;  %v2211_v2 = vpop.f32.mrf.mxu0  ;;  %v1059_v3 = vsel %vm827_vm1, %v2913_v51, inf }
 0x113   : > { %v578_v6 = vpop.f32.mrf.mxu0 }
 0x114   : > { %v2944_v15 = vadd.f32 %v2746_v4, %v578_v6 }
 0x115   : > { %1138 = vmin.xlane.f32.xlu1 %v1137_v12  ;;  %1135 = vmin.xlane.f32.xlu0 %v1134_v13  ;;  %v2259_v12 = vpop.f32.mrf.mxu1  ;;  %v2941_v13 = vadd.f32 %v2211_v2, %v2746_v4 }
 0x116   : > { %v1062_v35 = vsel %vm827_vm1, %v2944_v15, inf }
 0x119   : > { %856 = vmax.xlane.f32.xlu1 %v855_v19  ;;  %853 = vmax.xlane.f32.xlu0 %v852_v20  ;;  %v1155_v19 = vsel %vm827_vm1, %v2923_v58, inf  ;;  %v1152_v20 = vsel %vm827_vm1, %v2926_v61, inf }
 0x11d   : > { %952 = vmax.xlane.f32.xlu1 %v951_v21  ;;  %949 = vmax.xlane.f32.xlu0 %v948_v23  ;;  %v738_v21 = vpop.f32.mrf.mxu1  ;;  %v2951_v23 = vadd.f32 %v2259_v12, %v2746_v4 }
 0x11e   : > { %v2954_v24 = vadd.f32 %v2746_v4, %v738_v21 }
 0x11f   : > { %v969_v28 = vsel %vm827_vm1, %v2951_v23, -inf  ;;  %v1161_v46 = vsel %vm827_vm1, %v2951_v23, inf }
 0x120   : > { %v966_v29 = vsel %vm827_vm1, %v2954_v24, -inf }
 0x121   : > { %1048 = vmin.xlane.f32.xlu1 %v1047_v25  ;;  %1045 = vmin.xlane.f32.xlu0 %v1044_v26  ;;  %v873_v25 = vsel %vm827_vm1, %v2941_v13, -inf  ;;  %v870_v26 = vsel %vm827_vm1, %v2944_v15, -inf }
 0x125   : > { %1144 = vmin.xlane.f32.xlu1 %v1143_v33  ;;  %1141 = vmin.xlane.f32.xlu0 %v1140_v34  ;;  %v2214_v33 = vpop.f32.mrf.mxu0  ;;  %v1065_v34 = vsel %vm827_vm1, %v2941_v13, inf }
 0x129   : > { %862 = vmax.xlane.f32.xlu1 %v861_v40  ;;  %859 = vmax.xlane.f32.xlu0 %v858_v41  ;;  %v588_v40 = vpop.f32.mrf.mxu0  ;;  %v2262_v41 = vpop.f32.mrf.mxu1 }
 0x12a   : > { %v2979_v49 = vadd.f32 %v2262_v41, %v2746_v4 }
 0x12c   : > { %v975_v57 = vsel %vm827_vm1, %v2979_v49, -inf }
 0x12d   : > { %958 = vmax.xlane.f32.xlu1 %v957_v42  ;;  %955 = vmax.xlane.f32.xlu0 %v954_v45  ;;  %v2969_v42 = vadd.f32 %v2214_v33, %v2746_v4  ;;  %v2972_v45 = vadd.f32 %v2746_v4, %v588_v40 }
 0x131   : > { %1054 = vmin.xlane.f32.xlu1 %v1053_v47  ;;  %1051 = vmin.xlane.f32.xlu0 %v1050_v48  ;;  %v1158_v47 = vsel %vm827_vm1, %v2954_v24, inf  ;;  %v748_v48 = vpop.f32.mrf.mxu1 }
 0x132   : > { %v2982_v50 = vadd.f32 %v2746_v4, %v748_v48 }
 0x134   : > { %v1164_v21 = vsel %vm827_vm1, %v2982_v50, inf }
 0x135   : > { %1150 = vmin.xlane.f32.xlu1 %v1149_v53  ;;  %1147 = vmin.xlane.f32.xlu0 %v1146_v56  ;;  %v879_v53 = vsel %vm827_vm1, %v2969_v42, -inf  ;;  %v876_v56 = vsel %vm827_vm1, %v2972_v45, -inf }
 0x139   : > { %868 = vmax.xlane.f32.xlu1 %v867_v62  ;;  %865 = vmax.xlane.f32.xlu0 %v864_v63  ;;  %v972_v62 = vsel %vm827_vm1, %v2982_v50, -inf  ;;  %v2217_v63 = vpop.f32.mrf.mxu0 }
 0x13a   : > { %v2997_v12 = vadd.f32 %v2217_v63, %v2746_v4 }
 0x13b   : > { %v598_v2 = vpop.f32.mrf.mxu0 }
 0x13c   : > { %3992 = vst [vmem:[#allocation2_spill] sm:$0xff] %v2997_v12 }
 0x13d   : > { %964 = vmax.xlane.f32.xlu1 %v963_v0  ;;  %961 = vmax.xlane.f32.xlu0 %v960_v1  ;;  %v1071_v0 = vsel %vm827_vm1, %v2969_v42, inf  ;;  %v1068_v1 = vsel %vm827_vm1, %v2972_v45, inf }
 0x141   : > { %1060 = vmin.xlane.f32.xlu1 %v1059_v3  ;;  %1057 = vmin.xlane.f32.xlu0 %v1056_v5  ;;  %v2265_v3 = vpop.f32.mrf.mxu1 }
 0x142   : > { %v3007_v33 = vadd.f32 %v2265_v3, %v2746_v4 }
 0x144   : > { %3994 = vst [vmem:[#allocation4_spill] sm:$0xff] %v3007_v33  ;;  %v981_v48 = vsel %vm827_vm1, %v3007_v33, -inf }
 0x145   : > { %1156 = vmin.xlane.f32.xlu1 %v1155_v19  ;;  %1153 = vmin.xlane.f32.xlu0 %v1152_v20  ;;  %v3000_v19 = vadd.f32 %v2746_v4, %v598_v2  ;;  %v1167_v20 = vsel %vm827_vm1, %v2979_v49, inf }
 0x147   : > { %3993 = vst [vmem:[#allocation3_spill] sm:$0xff] %v3000_v19  ;;  %v882_v40 = vsel %vm827_vm1, %v3000_v19, -inf }
 0x149   : > { %874 = vmax.xlane.f32.xlu1 %v873_v25  ;;  %871 = vmax.xlane.f32.xlu0 %v870_v26  ;;  %v758_v25 = vpop.f32.mrf.mxu1 }
 0x14b   : > { %v2268_v3 = vpop.f32.mrf.mxu1 }
 0x14d   : > { %970 = vmax.xlane.f32.xlu1 %v969_v28  ;;  %967 = vmax.xlane.f32.xlu0 %v966_v29 }
 0x151   : > { %1066 = vmin.xlane.f32.xlu1 %v1065_v34  ;;  %1063 = vmin.xlane.f32.xlu0 %v1062_v35  ;;  %v3010_v34 = vadd.f32 %v2746_v4, %v758_v25  ;;  %v885_v35 = vsel %vm827_vm1, %v2997_v12, -inf }
 0x153   : > { %3995 = vst [vmem:[#allocation5_spill] sm:$0xff] %v3010_v34 }
 0x155   : > { %1162 = vmin.xlane.f32.xlu1 %v1161_v46  ;;  %1159 = vmin.xlane.f32.xlu0 %v1158_v47 }
 0x159   : > { %880 = vmax.xlane.f32.xlu1 %v879_v53  ;;  %877 = vmax.xlane.f32.xlu0 %v876_v56  ;;  %v978_v53 = vsel %vm827_vm1, %v3010_v34, -inf  ;;  %v2220_v56 = vpop.f32.mrf.mxu0 }
 0x15b   : > { %v608_v2 = vpop.f32.mrf.mxu0 }
 0x15c   : > { %v3028_v25 = vadd.f32 %v2746_v4, %v608_v2 }
 0x15d   : > { %976 = vmax.xlane.f32.xlu1 %v975_v57  ;;  %973 = vmax.xlane.f32.xlu0 %v972_v62 }
 0x15e   : > { %3997 = vst [vmem:[#allocation7_spill] sm:$0xff] %v3028_v25 }
 0x161   : > { %1072 = vmin.xlane.f32.xlu1 %v1071_v0  ;;  %1069 = vmin.xlane.f32.xlu0 %v1068_v1  ;;  %v1077_v0 = vsel %vm827_vm1, %v2997_v12, inf  ;;  %v1074_v1 = vsel %vm827_vm1, %v3000_v19, inf }
 0x162   : > { %v929_v5 = vpop.xlane.xlu1 %928  ;;  %v833_v6 = vpop.xlane.xlu0 %832 }
 0x165   : > { %1168 = vmin.xlane.f32.xlu1 %v1167_v20  ;;  %1165 = vmin.xlane.f32.xlu0 %v1164_v21  ;;  %v3025_v21 = vadd.f32 %v2220_v56, %v2746_v4 }
 0x166   : > { %v1025_v26 = vpop.xlane.xlu1 %1024  ;;  %v830_v28 = vpop.xlane.xlu0 %829 }
 0x167   : > { %v1277_v29 = vsub.f32 %v833_v6, %v1025_v26  ;;  %3996 = vst [vmem:[#allocation6_spill] sm:$0xff] %v3025_v21 }
 0x169   : > { %2300 = vrcp.f32 %v1277_v29  ;;  %886 = vmax.xlane.f32.xlu1 %v885_v35  ;;  %883 = vmax.xlane.f32.xlu0 %v882_v40  ;;  %v1170_v29 = vsel %vm827_vm1, %v3010_v34, inf  ;;  %v1213_v35 = vsub.f32 %v2749_v7, %v1025_v26  ;;  %v768_v40 = vpop.f32.mrf.mxu1  ;;  %v888_v7 = vsel %vm827_vm1, %v3028_v25, -inf }
 0x16a   : > { %v1121_v41 = vpop.xlane.xlu1 %1120  ;;  %v926_v46 = vpop.xlane.xlu0 %925 }
 0x16b   : > { %v1309_v47 = vsub.f32 %v929_v5, %v1121_v41  ;;  %v1245_v26 = vsub.f32 %v2752_v8, %v1121_v41  ;;  %v2223_v8 = vpop.f32.mrf.mxu0 }
 0x16d   : > { %2302 = vrcp.f32 %v1309_v47  ;;  %982 = vmax.xlane.f32.xlu1 %v981_v48  ;;  %979 = vmax.xlane.f32.xlu0 %v978_v53 }
 0x16e   : > { %v839_v57 = vpop.xlane.xlu1 %838  ;;  %v1022_v62 = vpop.xlane.xlu0 %1021 }
 0x16f   : > { %v1276_v63 = vsub.f32 %v830_v28, %v1022_v62  ;;  %v1173_v28 = vsel %vm827_vm1, %v3007_v33, inf }
 0x171   : > { %2304 = vrcp.f32 %v1276_v63  ;;  %1078 = vmin.xlane.f32.xlu1 %v1077_v0  ;;  %1075 = vmin.xlane.f32.xlu0 %v1074_v1  ;;  %v3038_v63 = vadd.f32 %v2268_v3, %v2746_v4  ;;  %v3041_v0 = vadd.f32 %v2746_v4, %v768_v40  ;;  %v891_v1 = vsel %vm827_vm1, %v3025_v21, -inf }
 0x172   : > { %v935_v5 = vpop.xlane.xlu1 %934  ;;  %v1118_v6 = vpop.xlane.xlu0 %1117  ;;  %v1212_v40 = vsub.f32 %v2755_v10, %v1022_v62 }
 0x173   : > { %v1308_v20 = vsub.f32 %v926_v46, %v1118_v6  ;;  %3999 = vst [vmem:[#allocation9_spill] sm:$0xff] %v3038_v63  ;;  %4000 = vst [vmem:[#allocation10_spill] sm:$0xff] %v3041_v0  ;;  %v1244_v10 = vsub.f32 %v2762_v14, %v1118_v6  ;;  %v618_v62 = vpop.f32.mrf.mxu0  ;;  %v1179_v14 = vsel %vm827_vm1, %v3038_v63, inf  ;;  %v1176_v6 = vsel %vm827_vm1, %v3041_v0, inf }
 0x175   : > { %2306 = vrcp.f32 %v1308_v20  ;;  %1174 = vmin.xlane.f32.xlu1 %v1173_v28  ;;  %1171 = vmin.xlane.f32.xlu0 %v1170_v29  ;;  %v987_v29 = vsel %vm827_vm1, %v3038_v63, -inf }
 0x176   : > { %v2301_v47 = vpop.eup %2300  ;;  %v1031_v46 = vpop.xlane.xlu1 %1030 }
 0x177   : > { %v932_v48 = vpop.xlane.xlu0 %931  ;;  %v3035_v53 = vmul.f32 %v2301_v47, %v1213_v35  ;;  %v1279_v56 = vsub.f32 %v839_v57, %v1031_v46  ;;  %v984_v35 = vsel %vm827_vm1, %v3041_v0, -inf }
 0x179   : > { %3998 = vst [vmem:[#allocation8_spill] sm:$0xff] %v3035_v53  ;;  %2308 = vrcp.f32 %v1279_v56  ;;  %892 = vmax.xlane.f32.xlu1 %v891_v1  ;;  %889 = vmax.xlane.f32.xlu0 %v888_v7  ;;  %v1469_v19 = vmul.f32 %v3035_v53, %v3035_v53 }
 0x17a   : > { %v2303_v2 = vpop.eup %2302  ;;  %v1127_v20 = vpop.xlane.xlu1 %1126 }
 0x17b   : > { %v3048_v57 = vpop.xlane.xlu0 %1027  ;;  %v3050_v3 = vmul.f32 %v2303_v2, %v1245_v26  ;;  %v1311_v28 = vsub.f32 %v935_v5, %v1127_v20  ;;  %v1083_v26 = vsel %vm827_vm1, %v3025_v21, inf  ;;  %v1080_v2 = vsel %vm827_vm1, %v3028_v25, inf  ;;  %v2226_v21 = vpop.f32.mrf.mxu0 }
 0x17d   : > { %4001 = vst [vmem:[#allocation11_spill] sm:$0xff] %v3050_v3  ;;  %2310 = vrcp.f32 %v1311_v28  ;;  %988 = vmax.xlane.f32.xlu1 %v987_v29  ;;  %985 = vmax.xlane.f32.xlu0 %v984_v35  ;;  %v2271_v28 = vpop.f32.mrf.mxu1 }
 0x17e   : > { %v2305_v41 = vpop.eup %2304  ;;  %v836_v47 = vpop.xlane.xlu1 %835 }
 0x17f   : > { %v1124_v56 = vpop.xlane.xlu0 %1123  ;;  %v3057_v1 = vmul.f32 %v2305_v41, %v1212_v40  ;;  %v1278_v7 = vsub.f32 %v836_v47, %v3048_v57  ;;  %v3071_v47 = vadd.f32 %v2746_v4, %v618_v62 }
 0x180   : > { %v1310_v5 = vsub.f32 %v932_v48, %v1124_v56  ;;  %v3068_v48 = vadd.f32 %v2223_v8, %v2746_v4  ;;  %v3081_v8 = vadd.f32 %v2271_v28, %v2746_v4 }
 0x181   : > { %4002 = vst [vmem:[#allocation12_spill] sm:$0xff] %v3057_v1  ;;  %2312 = vrcp.f32 %v1278_v7  ;;  %1084 = vmin.xlane.f32.xlu1 %v1083_v26  ;;  %1081 = vmin.xlane.f32.xlu0 %v1080_v2  ;;  %4005 = vst [vmem:[#allocation15_spill] sm:$0xff] %v3071_v47  ;;  %v1215_v7 = vsub.f32 %v2769_v18, %v1031_v46  ;;  %v894_v18 = vsel %vm827_vm1, %v3071_v47, -inf }
 0x182   : > { %v2307_v29 = vpop.eup %2306  ;;  %2314 = vrcp.f32 %v1310_v5  ;;  %v845_v35 = vpop.xlane.xlu1 %844  ;;  %4004 = vst [vmem:[#allocation14_spill] sm:$0xff] %v3068_v48  ;;  %4007 = vst [vmem:[#allocation17_spill] sm:$0xff] %v3081_v8  ;;  %v897_v63 = vsel %vm827_vm1, %v3068_v48, -inf  ;;  %v1247_v46 = vsub.f32 %v2776_v22, %v1127_v20  ;;  %v1246_v20 = vsub.f32 %v2785_v27, %v1124_v56 }
 0x183   : > { %v842_v40 = vpop.xlane.xlu0 %841  ;;  %v3065_v41 = vmul.f32 %v2307_v29, %v1244_v10  ;;  %v778_v5 = vpop.f32.mrf.mxu1  ;;  %v3109_v56 = vadd.f32 %v2226_v21, %v2746_v4 }
 0x184   : > { %v3084_v62 = vadd.f32 %v2746_v4, %v778_v5  ;;  %v993_v5 = vsel %vm827_vm1, %v3081_v8, -inf  ;;  %v628_v27 = vpop.f32.mrf.mxu0 }
 0x185   : > { %4003 = vst [vmem:[#allocation13_spill] sm:$0xff] %v3065_v41  ;;  %1180 = vmin.xlane.f32.xlu1 %v1179_v14  ;;  %1177 = vmin.xlane.f32.xlu0 %v1176_v6  ;;  %4012 = vst [vmem:[#allocation22_spill] sm:$0xff] %v3109_v56 }
 0x186   : > { %v2309_v26 = vpop.eup %2308  ;;  %v941_v2 = vpop.xlane.xlu1 %940  ;;  %4008 = vst [vmem:[#allocation18_spill] sm:$0xff] %v3084_v62  ;;  %v990_v25 = vsel %vm827_vm1, %v3084_v62, -inf }
 0x187   : > { %v938_v10 = vpop.xlane.xlu0 %937  ;;  %v3078_v29 = vmul.f32 %v2309_v26, %v1215_v7 }
 0x189   : > { %4006 = vst [vmem:[#allocation16_spill] sm:$0xff] %v3078_v29  ;;  %898 = vmax.xlane.f32.xlu1 %v897_v63  ;;  %895 = vmax.xlane.f32.xlu0 %v894_v18  ;;  %v1214_v63 = vsub.f32 %v2790_v30, %v3048_v57  ;;  %v2274_v30 = vpop.f32.mrf.mxu1 }
 0x18a   : > { %v2311_v14 = vpop.eup %2310  ;;  %v1037_v6 = vpop.xlane.xlu1 %1036 }
 0x18b   : > { %v1034_v7 = vpop.xlane.xlu0 %1033  ;;  %v3091_v26 = vmul.f32 %v2311_v14, %v1247_v46  ;;  %v1281_v28 = vsub.f32 %v845_v35, %v1037_v6 }
 0x18c   : > { %v1280_v0 = vsub.f32 %v842_v40, %v1034_v7 }
 0x18d   : > { %4009 = vst [vmem:[#allocation19_spill] sm:$0xff] %v3091_v26  ;;  %2316 = vrcp.f32 %v1281_v28  ;;  %994 = vmax.xlane.f32.xlu1 %v993_v5  ;;  %991 = vmax.xlane.f32.xlu0 %v990_v25  ;;  %v1089_v28 = vsel %vm827_vm1, %v3068_v48, inf  ;;  %v1086_v25 = vsel %vm827_vm1, %v3071_v47, inf }
 0x18e   : > { %v2313_v22 = vpop.eup %2312  ;;  %2318 = vrcp.f32 %v1280_v0  ;;  %v1133_v18 = vpop.xlane.xlu1 %1132 }
 0x18f   : > { %v1130_v35 = vpop.xlane.xlu0 %1129  ;;  %v2315_v40 = vpop.eup %2314  ;;  %v1313_v46 = vsub.f32 %v941_v2, %v1133_v18  ;;  %v3106_v5 = vmul.f32 %v2313_v22, %v1214_v63  ;;  %v3112_v2 = vadd.f32 %v2746_v4, %v628_v27  ;;  %v1182_v22 = vsel %vm827_vm1, %v3084_v62, inf }
 0x190   : > { %v1312_v14 = vsub.f32 %v938_v10, %v1130_v35  ;;  %v3100_v34 = vmul.f32 %v2315_v40, %v1246_v20  ;;  %v1185_v10 = vsel %vm827_vm1, %v3081_v8, inf  ;;  %v788_v63 = vpop.f32.mrf.mxu1 }
 0x191   : > { %4011 = vst [vmem:[#allocation21_spill] sm:$0xff] %v3106_v5  ;;  %2320 = vrcp.f32 %v1313_v46  ;;  %1090 = vmin.xlane.f32.xlu1 %v1089_v28  ;;  %1087 = vmin.xlane.f32.xlu0 %v1086_v25  ;;  %4013 = vst [vmem:[#allocation23_spill] sm:$0xff] %v3112_v2  ;;  %v3119_v46 = vadd.f32 %v2274_v30, %v2746_v4  ;;  %v3122_v21 = vadd.f32 %v2746_v4, %v788_v63 }
 0x192   : > { %4010 = vst [vmem:[#allocation20_spill] sm:$0xff] %v3100_v34  ;;  %2322 = vrcp.f32 %v1312_v14  ;;  %v851_v0 = vpop.xlane.xlu1 %850  ;;  %v903_v14 = vsel %vm827_vm1, %v3109_v56, -inf  ;;  %v900_v28 = vsel %vm827_vm1, %v3112_v2, -inf  ;;  %v1217_v25 = vsub.f32 %v2801_v38, %v1037_v6 }
 0x193   : > { %v848_v57 = vpop.xlane.xlu0 %847  ;;  %4014 = vst [vmem:[#allocation24_spill] sm:$0xff] %v3119_v46  ;;  %4015 = vst [vmem:[#allocation25_spill] sm:$0xff] %v3122_v21  ;;  %v999_v33 = vsel %vm827_vm1, %v3119_v46, -inf  ;;  %v996_v38 = vsel %vm827_vm1, %v3122_v21, -inf  ;;  %v1249_v6 = vsub.f32 %v2811_v43, %v1133_v18  ;;  %v1095_v43 = vsel %vm827_vm1, %v3109_v56, inf }
 0x195   : > { %1186 = vmin.xlane.f32.xlu1 %v1185_v10  ;;  %1183 = vmin.xlane.f32.xlu0 %v1182_v22  ;;  %v1216_v10 = vsub.f32 %v2804_v39, %v1034_v7  ;;  %v2229_v39 = vpop.f32.mrf.mxu0 }
 0x196   : > { %v947_v20 = vpop.xlane.xlu1 %946 }
 0x197   : > { %v944_v40 = vpop.xlane.xlu0 %943 }
 0x199   : > { %904 = vmax.xlane.f32.xlu1 %v903_v14  ;;  %901 = vmax.xlane.f32.xlu0 %v900_v28  ;;  %v1248_v14 = vsub.f32 %v2814_v44, %v1130_v35  ;;  %v638_v44 = vpop.f32.mrf.mxu0 }
 0x19a   : > { %v2317_v27 = vpop.eup %2316  ;;  %v1043_v22 = vpop.xlane.xlu1 %1042 }
 0x19b   : > { %v1040_v62 = vpop.xlane.xlu0 %1039  ;;  %v2319_v30 = vpop.eup %2318  ;;  %v3130_v8 = vmul.f32 %v2317_v27, %v1217_v25  ;;  %v1283_v63 = vsub.f32 %v851_v0, %v1043_v22 }
 0x19c   : > { %v3132_v47 = vmul.f32 %v2319_v30, %v1216_v10  ;;  %v1282_v48 = vsub.f32 %v848_v57, %v1040_v62 }
 0x19d   : > { %4016 = vst [vmem:[#allocation26_spill] sm:$0xff] %v3130_v8  ;;  %2324 = vrcp.f32 %v1283_v63  ;;  %1000 = vmax.xlane.f32.xlu1 %v999_v33  ;;  %997 = vmax.xlane.f32.xlu0 %v996_v38  ;;  %v1092_v33 = vsel %vm827_vm1, %v3112_v2, inf  ;;  %v3149_v63 = vadd.f32 %v2229_v39, %v2746_v4  ;;  %v1188_v38 = vsel %vm827_vm1, %v3122_v21, inf }
 0x19e   : > { %v2321_v7 = vpop.eup %2320  ;;  %2326 = vrcp.f32 %v1282_v48  ;;  %v1139_v0 = vpop.xlane.xlu1 %1138 }
 0x19f   : > { %v1136_v28 = vpop.xlane.xlu0 %1135  ;;  %v2323_v25 = vpop.eup %2322  ;;  %v3140_v57 = vmul.f32 %v2321_v7, %v1249_v6  ;;  %v1315_v27 = vsub.f32 %v947_v20, %v1139_v0  ;;  %4017 = vst [vmem:[#allocation27_spill] sm:$0xff] %v3149_v63  ;;  %v3152_v20 = vadd.f32 %v2746_v4, %v638_v44  ;;  %v1218_v44 = vsub.f32 %v2832_v55, %v1040_v62 }
 0x1a0   : > { %v3142_v10 = vmul.f32 %v2323_v25, %v1248_v14  ;;  %v1314_v30 = vsub.f32 %v944_v40, %v1136_v28  ;;  %v2277_v48 = vpop.f32.mrf.mxu1  ;;  %v1191_v40 = vsel %vm827_vm1, %v3119_v46, inf  ;;  %v2232_v55 = vpop.f32.mrf.mxu0 }
 0x1a1   : > { %2328 = vrcp.f32 %v1315_v27  ;;  %1096 = vmin.xlane.f32.xlu1 %v1095_v43  ;;  %1093 = vmin.xlane.f32.xlu0 %v1092_v33  ;;  %4018 = vst [vmem:[#allocation28_spill] sm:$0xff] %v3152_v20  ;;  %v3159_v25 = vadd.f32 %v2277_v48, %v2746_v4  ;;  %v909_v27 = vsel %vm827_vm1, %v3149_v63, -inf  ;;  %v1219_v43 = vsub.f32 %v2829_v54, %v1043_v22 }
 0x1a2   : > { %2330 = vrcp.f32 %v1314_v30  ;;  %v857_v18 = vpop.xlane.xlu1 %856  ;;  %v798_v6 = vpop.f32.mrf.mxu1  ;;  %v906_v30 = vsel %vm827_vm1, %v3152_v20, -inf  ;;  %v1251_v22 = vsub.f32 %v2839_v59, %v1139_v0  ;;  %v1101_v59 = vsel %vm827_vm1, %v3149_v63, inf }
 0x1a3   : > { %v854_v35 = vpop.xlane.xlu0 %853  ;;  %4019 = vst [vmem:[#allocation29_spill] sm:$0xff] %v3159_v25  ;;  %v3162_v39 = vadd.f32 %v2746_v4, %v798_v6  ;;  %v1005_v56 = vsel %vm827_vm1, %v3159_v25, -inf }
 0x1a5   : > { %1192 = vmin.xlane.f32.xlu1 %v1191_v40  ;;  %1189 = vmin.xlane.f32.xlu0 %v1188_v38  ;;  %4020 = vst [vmem:[#allocation30_spill] sm:$0xff] %v3162_v39  ;;  %v1002_v54 = vsel %vm827_vm1, %v3162_v39, -inf }
 0x1a6   : > { %v953_v7 = vpop.xlane.xlu1 %952 }
 0x1a7   : > { %v950_v14 = vpop.xlane.xlu0 %949 }
 0x1a9   : > { %910 = vmax.xlane.f32.xlu1 %v909_v27  ;;  %907 = vmax.xlane.f32.xlu0 %v906_v30  ;;  %v1250_v27 = vsub.f32 %v2842_v60, %v1136_v28  ;;  %v648_v60 = vpop.f32.mrf.mxu0 }
 0x1aa   : > { %v2325_v33 = vpop.eup %2324  ;;  %v1049_v40 = vpop.xlane.xlu1 %1048 }
 0x1ab   : > { %v1046_v38 = vpop.xlane.xlu0 %1045  ;;  %v2327_v48 = vpop.eup %2326  ;;  %v3170_v21 = vmul.f32 %v2325_v33, %v1219_v43  ;;  %v1285_v6 = vsub.f32 %v857_v18, %v1049_v40 }
 0x1ac   : > { %v3172_v46 = vmul.f32 %v2327_v48, %v1218_v44  ;;  %v1284_v2 = vsub.f32 %v854_v35, %v1046_v38 }
 0x1ad   : > { %2332 = vrcp.f32 %v1285_v6  ;;  %1006 = vmax.xlane.f32.xlu1 %v1005_v56  ;;  %1003 = vmax.xlane.f32.xlu0 %v1002_v54  ;;  %v1098_v56 = vsel %vm827_vm1, %v3152_v20, inf  ;;  %v1197_v6 = vsel %vm827_vm1, %v3159_v25, inf  ;;  %v1194_v54 = vsel %vm827_vm1, %v3162_v39, inf }
 0x1ae   : > { %v2329_v62 = vpop.eup %2328  ;;  %2334 = vrcp.f32 %v1284_v2  ;;  %v1145_v18 = vpop.xlane.xlu1 %1144 }
 0x1af   : > { %v1142_v30 = vpop.xlane.xlu0 %1141  ;;  %v2331_v43 = vpop.eup %2330  ;;  %v3180_v35 = vmul.f32 %v2329_v62, %v1251_v22  ;;  %v1317_v33 = vsub.f32 %v953_v7, %v1145_v18  ;;  %v3193_v7 = vadd.f32 %v2232_v55, %v2746_v4 }
 0x1b0   : > { %v3182_v44 = vmul.f32 %v2331_v43, %v1250_v27  ;;  %v1316_v48 = vsub.f32 %v950_v14, %v1142_v30  ;;  %v2280_v2 = vpop.f32.mrf.mxu1  ;;  %v3196_v14 = vadd.f32 %v2746_v4, %v648_v60  ;;  %v1220_v60 = vsub.f32 %v2860_v11, %v1046_v38  ;;  %v2235_v11 = vpop.f32.mrf.mxu0 }
 0x1b1   : > { %2336 = vrcp.f32 %v1317_v33  ;;  %1102 = vmin.xlane.f32.xlu1 %v1101_v59  ;;  %1099 = vmin.xlane.f32.xlu0 %v1098_v56  ;;  %4022 = vst [vmem:[#allocation32_spill] sm:$0xff] %v3193_v7  ;;  %v3207_v43 = vadd.f32 %v2280_v2, %v2746_v4  ;;  %v915_v33 = vsel %vm827_vm1, %v3193_v7, -inf  ;;  %v1221_v59 = vsub.f32 %v2857_v9, %v1049_v40 }
 0x1b2   : > { %4021 = vst [vmem:[#allocation31_spill] sm:$0xff] %v3182_v44  ;;  %2338 = vrcp.f32 %v1316_v48  ;;  %v3188_v0 = vpop.xlane.xlu1 %862  ;;  %4023 = vst [vmem:[#allocation33_spill] sm:$0xff] %v3196_v14  ;;  %v808_v22 = vpop.f32.mrf.mxu1  ;;  %v912_v48 = vsel %vm827_vm1, %v3196_v14, -inf  ;;  %v1253_v40 = vsub.f32 %v2867_v16, %v1145_v18  ;;  %v1107_v20 = vsel %vm827_vm1, %v3193_v7, inf }
 0x1b3   : > { %v3190_v28 = vpop.xlane.xlu0 %859  ;;  %4024 = vst [vmem:[#allocation34_spill] sm:$0xff] %v3207_v43  ;;  %v3210_v55 = vadd.f32 %v2746_v4, %v808_v22  ;;  %v1011_v25 = vsel %vm827_vm1, %v3207_v43, -inf  ;;  %v1104_v16 = vsel %vm827_vm1, %v3196_v14, inf }
 0x1b4   : > { %v2283_v18 = vpop.f32.mrf.mxu1 }
 0x1b5   : > { %1198 = vmin.xlane.f32.xlu1 %v1197_v6  ;;  %1195 = vmin.xlane.f32.xlu0 %v1194_v54  ;;  %4025 = vst [vmem:[#allocation35_spill] sm:$0xff] %v3210_v55  ;;  %v1008_v9 = vsel %vm827_vm1, %v3210_v55, -inf }
 0x1b6   : > { %v3202_v62 = vpop.xlane.xlu1 %958 }
 0x1b7   : > { %v3204_v27 = vpop.xlane.xlu0 %955 }
 0x1b9   : > { %916 = vmax.xlane.f32.xlu1 %v915_v33  ;;  %913 = vmax.xlane.f32.xlu0 %v912_v48  ;;  %v1252_v33 = vsub.f32 %v2870_v17, %v1142_v30 }
 0x1ba   : > { %v2333_v56 = vpop.eup %2332  ;;  %v3218_v6 = vpop.xlane.xlu1 %1054 }
 0x1bb   : > { %v3220_v2 = vpop.xlane.xlu0 %1051  ;;  %v2335_v54 = vpop.eup %2334  ;;  %v3222_v22 = vmul.f32 %v2333_v56, %v1221_v59 }
 0x1bc   : > { %v3224_v39 = vmul.f32 %v2335_v54, %v1220_v60 }
 0x1bd   : > { %4026 = vst [vmem:[#allocation36_spill] sm:$0xff] %v3222_v22  ;;  %1012 = vmax.xlane.f32.xlu1 %v1011_v25  ;;  %1009 = vmax.xlane.f32.xlu0 %v1008_v9  ;;  %v658_v25 = vpop.f32.mrf.mxu0  ;;  %v3249_v9 = vadd.f32 %v2235_v11, %v2746_v4 }
 0x1be   : > { %4027 = vst [vmem:[#allocation37_spill] sm:$0xff] %v3224_v39  ;;  %v2337_v38 = vpop.eup %2336  ;;  %v3232_v48 = vpop.xlane.xlu1 %1150 }
 0x1bf   : > { %v3234_v59 = vpop.xlane.xlu0 %1147  ;;  %v2339_v56 = vpop.eup %2338  ;;  %v3236_v60 = vmul.f32 %v2337_v38, %v1253_v40  ;;  %4028 = vst [vmem:[#allocation38_spill] sm:$0xff] %v3249_v9  ;;  %v2556_v40 = vld [vmem:[%s3944_s2] ss:$0 sm:$0xff] }
 0x1c0   : > { %v3238_v54 = vmul.f32 %v2339_v56, %v1252_v33  ;;  %v3254_v38 = vadd.f32 %v2556_v40, %v658_v25  ;;  %v1203_v33 = vsel %vm827_vm1, %v3207_v43, inf  ;;  %v818_v56 = vpop.f32.mrf.mxu1  ;;  %v3264_v4 = vadd.f32 %v2556_v40, %v2283_v18 }
 0x1c1   : > { %1108 = vmin.xlane.f32.xlu1 %v1107_v20  ;;  %1105 = vmin.xlane.f32.xlu0 %v1104_v16  ;;  %v1200_v20 = vsel %vm827_vm1, %v3210_v55, inf  ;;  %v3266_v11 = vadd.f32 %v2556_v40, %v818_v56  ;;  %v921_v25 = vsel %vm827_vm1, %v3249_v9, -inf }
 0x1c2   : > { %v3244_v17 = vpop.xlane.xlu1 %868  ;;  %4029 = vst [vmem:[#allocation39_spill] sm:$0xff] %v3254_v38  ;;  %4030 = vst [vmem:[#allocation40_spill] sm:$0xff] %v3264_v4  ;;  %v918_v43 = vsel %vm827_vm1, %v3254_v38, -inf }
 0x1c3   : > { %v3246_v30 = vpop.xlane.xlu0 %865  ;;  %4031 = vst [vmem:[#allocation41_spill] sm:$0xff] %v3266_v11  ;;  %v1014_v18 = vsel %vm827_vm1, %v3266_v11, -inf }
 0x1c5   : > { %1204 = vmin.xlane.f32.xlu1 %v1203_v33  ;;  %1201 = vmin.xlane.f32.xlu0 %v1200_v20  ;;  %v1017_v20 = vsel %vm827_vm1, %v3264_v4, -inf }
 0x1c6   : > { %v3260_v16 = vpop.xlane.xlu1 %964 }
 0x1c7   : > { %v3262_v14 = vpop.xlane.xlu0 %961 }
 0x1c9   : > { %922 = vmax.xlane.f32.xlu1 %v921_v25  ;;  %919 = vmax.xlane.f32.xlu0 %v918_v43  ;;  %v1113_v25 = vsel %vm827_vm1, %v3249_v9, inf  ;;  %v1110_v43 = vsel %vm827_vm1, %v3254_v38, inf  ;;  %v1468_v9 = vmul.f32 %v3057_v1, %v3057_v1  ;;  %v1535_v38 = vsel %vm827_vm1, %v1469_v19, 0.0 }
 0x1ca   : > { %v3272_v55 = vpop.xlane.xlu1 %1060  ;;  %v1471_v19 = vmul.f32 %v3078_v29, %v3078_v29 }
 0x1cb   : > { %v3274_v33 = vpop.xlane.xlu0 %1057  ;;  %v1532_v12 = vsel %vm827_vm1, %v1468_v9, 0.0  ;;  %v1470_v9 = vmul.f32 %v3106_v5, %v3106_v5 }
 0x1cd   : > { %1018 = vmax.xlane.f32.xlu1 %v1017_v20  ;;  %1015 = vmax.xlane.f32.xlu0 %v1014_v18  ;;  %v1209_v20 = vsel %vm827_vm1, %v3264_v4, inf  ;;  %v1206_v18 = vsel %vm827_vm1, %v3266_v11, inf  ;;  %v1501_v4 = vmul.f32 %v3050_v3, %v3050_v3  ;;  %v1500_v11 = vmul.f32 %v3065_v41, %v3065_v41 }
 0x1ce   : > { %v3280_v40 = vpop.xlane.xlu1 %1156  ;;  %v1538_v41 = vsel %vm827_vm1, %v1470_v9, 0.0  ;;  %v1286_v9 = vsub.f32 %v3190_v28, %v3220_v2 }
 0x1cf   : > { %v3282_v56 = vpop.xlane.xlu0 %1153  ;;  %v1628_v1 = vsel %vm827_vm1, %v1500_v11, 0.0  ;;  %v1502_v11 = vmul.f32 %v3100_v34, %v3100_v34 }
 0x1d1   : > { %1114 = vmin.xlane.f32.xlu1 %v1113_v25  ;;  %1111 = vmin.xlane.f32.xlu0 %v1110_v43  ;;  %v1634_v5 = vsel %vm827_vm1, %v1502_v11, 0.0  ;;  %v1505_v11 = vmul.f32 %v3140_v57, %v3140_v57 }
 0x1d2   : > { %v3288_v7 = vpop.xlane.xlu1 %874 }
 0x1d3   : > { %v3290_v63 = vpop.xlane.xlu0 %871 }
 0x1d5   : > { %1210 = vmin.xlane.f32.xlu1 %v1209_v20  ;;  %1207 = vmin.xlane.f32.xlu0 %v1206_v18  ;;  %v1631_v18 = vsel %vm827_vm1, %v1501_v4, 0.0  ;;  %v1503_v4 = vmul.f32 %v3091_v26, %v3091_v26 }
 0x1d6   : > { %v3300_v25 = vpop.xlane.xlu1 %970 }
 0x1d7   : > { %v3302_v43 = vpop.xlane.xlu0 %967  ;;  %v1637_v26 = vsel %vm827_vm1, %v1503_v4, 0.0 }
 0x1d9   : > { %1536 = vadd.xlane.f32.xlu1 %v1535_v38  ;;  %1533 = vadd.xlane.f32.xlu0 %v1532_v12  ;;  %v1541_v12 = vsel %vm827_vm1, %v1471_v19, 0.0  ;;  %v1473_v19 = vmul.f32 %v3130_v8, %v3130_v8 }
 0x1da   : > { %v3310_v53 = vpop.xlane.xlu1 %1066 }
 0x1db   : > { %v3312_v20 = vpop.xlane.xlu0 %1063  ;;  %v1547_v28 = vsel %vm827_vm1, %v1473_v19, 0.0  ;;  %v1475_v19 = vmul.f32 %v3170_v21, %v3170_v21 }
 0x1dd   : > { %1632 = vadd.xlane.f32.xlu1 %v1631_v18  ;;  %1629 = vadd.xlane.f32.xlu0 %v1628_v1  ;;  %v1287_v1 = vsub.f32 %v3188_v0, %v3218_v6  ;;  %v1318_v0 = vsub.f32 %v3204_v27, %v3234_v59 }
 0x1de   : > { %v3320_v3 = vpop.xlane.xlu1 %1162 }
 0x1df   : > { %v3322_v38 = vpop.xlane.xlu0 %1159  ;;  %2340 = vrcp.f32 %v1287_v1  ;;  %v1288_v1 = vsub.f32 %v3246_v30, %v3274_v33  ;;  %v1321_v30 = vsub.f32 %v3260_v16, %v3280_v40 }
 0x1e0   : > { %2342 = vrcp.f32 %v1286_v9  ;;  %v1643_v9 = vsel %vm827_vm1, %v1505_v11, 0.0 }
 0x1e1   : > { %1542 = vadd.xlane.f32.xlu1 %v1541_v12  ;;  %1539 = vadd.xlane.f32.xlu0 %v1538_v41  ;;  %v1472_v41 = vmul.f32 %v3132_v47, %v3132_v47  ;;  %v1319_v12 = vsub.f32 %v3202_v62, %v3232_v48 }
 0x1e2   : > { %v3330_v29 = vpop.xlane.xlu1 %880 }
 0x1e3   : > { %v3332_v18 = vpop.xlane.xlu0 %877  ;;  %v1544_v4 = vsel %vm827_vm1, %v1472_v41, 0.0  ;;  %2344 = vrcp.f32 %v1319_v12  ;;  %v1474_v12 = vmul.f32 %v3172_v46, %v3172_v46 }
 0x1e4   : > { %2346 = vrcp.f32 %v1318_v0 }
 0x1e5   : > { %1638 = vadd.xlane.f32.xlu1 %v1637_v26  ;;  %1635 = vadd.xlane.f32.xlu0 %v1634_v5  ;;  %v1504_v26 = vmul.f32 %v3142_v10, %v3142_v10  ;;  %v1289_v5 = vsub.f32 %v3244_v17, %v3272_v55  ;;  %v1550_v11 = vsel %vm827_vm1, %v1474_v12, 0.0  ;;  %v1290_v12 = vsub.f32 %v3290_v63, %v3312_v20 }
 0x1e6   : > { %v3348_v34 = vpop.xlane.xlu1 %976  ;;  %v1254_v63 = vsub.f32 %v2898_v37, %v3234_v59  ;;  %v1508_v59 = vmul.f32 %v3238_v54, %v3238_v54 }
 0x1e7   : > { %v3350_v8 = vpop.xlane.xlu0 %973  ;;  %v1640_v41 = vsel %vm827_vm1, %v1504_v26, 0.0  ;;  %2348 = vrcp.f32 %v1289_v5  ;;  %v1507_v26 = vmul.f32 %v3180_v35, %v3180_v35  ;;  %v1506_v5 = vmul.f32 %v3182_v44, %v3182_v44 }
 0x1e8   : > { %2350 = vrcp.f32 %v1288_v1  ;;  %v1291_v1 = vsub.f32 %v3288_v7, %v3310_v53  ;;  %v1223_v44 = vsub.f32 %v2885_v31, %v3218_v6 }
 0x1e9   : > { %1548 = vadd.xlane.f32.xlu1 %v1547_v28  ;;  %1545 = vadd.xlane.f32.xlu0 %v1544_v4  ;;  %v1553_v28 = vsel %vm827_vm1, %v1475_v19, 0.0  ;;  %v1320_v4 = vsub.f32 %v3262_v14, %v3282_v56  ;;  %2352 = vrcp.f32 %v1321_v30  ;;  %v1477_v14 = vmul.f32 %v3222_v22, %v3222_v22 }
 0x1ea   : > { %v3360_v62 = vpop.xlane.xlu1 %1072  ;;  %v1476_v19 = vmul.f32 %v3224_v39, %v3224_v39  ;;  %v1646_v7 = vsel %vm827_vm1, %v1506_v5, 0.0  ;;  %v1222_v30 = vsub.f32 %v2888_v32, %v3220_v2  ;;  %v1322_v32 = vsub.f32 %v3302_v43, %v3322_v38 }
 0x1eb   : > { %v3362_v27 = vpop.xlane.xlu0 %1069  ;;  %2354 = vrcp.f32 %v1320_v4  ;;  %v1255_v4 = vsub.f32 %v2895_v36, %v3232_v48  ;;  %v1559_v6 = vsel %vm827_vm1, %v1477_v14, 0.0  ;;  %v1509_v36 = vmul.f32 %v3236_v60, %v3236_v60 }
 0x1ec   : > { %2356 = vrcp.f32 %v1291_v1  ;;  %v1556_v2 = vsel %vm827_vm1, %v1476_v19, 0.0 }
 0x1ed   : > { %1644 = vadd.xlane.f32.xlu1 %v1643_v9  ;;  %1641 = vadd.xlane.f32.xlu0 %v1640_v41  ;;  %v2341_v41 = vpop.eup %2340  ;;  %2358 = vrcp.f32 %v1290_v12 }
 0x1ee   : > { %v3372_v17 = vpop.xlane.xlu1 %1168  ;;  %v3420_v37 = vmul.f32 %v2341_v41, %v1223_v44  ;;  %v1293_v44 = vsub.f32 %v3330_v29, %v3360_v62  ;;  %v1655_v41 = vsel %vm827_vm1, %v1509_v36, 0.0  ;;  %v1224_v29 = vsub.f32 %v2916_v52, %v3274_v33 }
 0x1ef   : > { %v3374_v0 = vpop.xlane.xlu0 %1165  ;;  %v1257_v36 = vsub.f32 %v2923_v58, %v3280_v40 }
 0x1f1   : > { %1554 = vadd.xlane.f32.xlu1 %v1553_v28  ;;  %1551 = vadd.xlane.f32.xlu0 %v1550_v11  ;;  %v1649_v28 = vsel %vm827_vm1, %v1507_v26, 0.0  ;;  %v2343_v11 = vpop.eup %2342  ;;  %v1323_v26 = vsub.f32 %v3300_v25, %v3320_v3 }
 0x1f2   : > { %v3388_v9 = vpop.xlane.xlu1 %886  ;;  %v2345_v22 = vpop.eup %2344  ;;  %v3422_v48 = vmul.f32 %v2343_v11, %v1222_v30  ;;  %v1225_v30 = vsub.f32 %v2913_v51, %v3272_v55  ;;  %v1325_v51 = vsub.f32 %v3348_v34, %v3372_v17  ;;  %v1324_v55 = vsub.f32 %v3350_v8, %v3374_v0 }
 0x1f3   : > { %v3390_v16 = vpop.xlane.xlu0 %883  ;;  %v2347_v31 = vpop.eup %2346  ;;  %v3426_v25 = vmul.f32 %v2345_v22, %v1255_v4  ;;  %2360 = vrcp.f32 %v1323_v26  ;;  %v1652_v22 = vsel %vm827_vm1, %v1508_v59, 0.0  ;;  %v1256_v59 = vsub.f32 %v2926_v61, %v3282_v56 }
 0x1f4   : > { %v3428_v43 = vmul.f32 %v2347_v31, %v1254_v63  ;;  %v2349_v19 = vpop.eup %2348  ;;  %2362 = vrcp.f32 %v1322_v32  ;;  %v1478_v11 = vmul.f32 %v3422_v48, %v3422_v48  ;;  %v1227_v34 = vsub.f32 %v2941_v13, %v3310_v53 }
 0x1f5   : > { %1650 = vadd.xlane.f32.xlu1 %v1649_v28  ;;  %1647 = vadd.xlane.f32.xlu0 %v1646_v7  ;;  %v2351_v12 = vpop.eup %2350  ;;  %v1292_v28 = vsub.f32 %v3332_v18, %v3362_v27  ;;  %v1479_v7 = vmul.f32 %v3420_v37, %v3420_v37  ;;  %v1511_v18 = vmul.f32 %v3426_v25, %v3426_v25  ;;  %2364 = vrcp.f32 %v1293_v44 }
 0x1f6   : > { %v3410_v5 = vpop.xlane.xlu1 %982  ;;  %v1510_v26 = vmul.f32 %v3428_v43, %v3428_v43  ;;  %v3456_v31 = vmul.f32 %v2349_v19, %v1225_v30  ;;  %v3458_v32 = vmul.f32 %v2351_v12, %v1224_v29  ;;  %v2353_v52 = vpop.eup %2352 }
 0x1f7   : > { %v3412_v39 = vpop.xlane.xlu0 %979  ;;  %2366 = vrcp.f32 %v1292_v28  ;;  %v1565_v33 = vsel %vm827_vm1, %v1479_v7, 0.0  ;;  %v1661_v8 = vsel %vm827_vm1, %v1511_v18, 0.0  ;;  %v3480_v40 = vmul.f32 %v2353_v52, %v1257_v36 }
 0x1f8   : > { %2368 = vrcp.f32 %v1325_v51  ;;  %v1481_v58 = vmul.f32 %v3456_v31, %v3456_v31  ;;  %v1480_v61 = vmul.f32 %v3458_v32, %v3458_v32  ;;  %v1259_v7 = vsub.f32 %v2951_v23, %v3320_v3 }
 0x1f9   : > { %1560 = vadd.xlane.f32.xlu1 %v1559_v6  ;;  %1557 = vadd.xlane.f32.xlu0 %v1556_v2  ;;  %v1562_v6 = vsel %vm827_vm1, %v1478_v11, 0.0  ;;  %v2355_v2 = vpop.eup %2354  ;;  %2370 = vrcp.f32 %v1324_v55  ;;  %v1258_v3 = vsub.f32 %v2954_v24, %v3322_v38 }
 0x1fa   : > { %v3430_v1 = vpop.xlane.xlu1 %1078  ;;  %v2357_v12 = vpop.eup %2356  ;;  %v3482_v13 = vmul.f32 %v2355_v2, %v1256_v59  ;;  %v1568_v51 = vsel %vm827_vm1, %v1480_v61, 0.0 }
 0x1fb   : > { %v3432_v14 = vpop.xlane.xlu0 %1075  ;;  %v1295_v28 = vsub.f32 %v3388_v9, %v3430_v1  ;;  %v2359_v56 = vpop.eup %2358  ;;  %v1226_v9 = vsub.f32 %v2944_v15, %v3312_v20  ;;  %v1513_v15 = vmul.f32 %v3480_v40, %v3480_v40 }
 0x1fc   : > { %v1294_v53 = vsub.f32 %v3390_v16, %v3432_v14  ;;  %v1512_v23 = vmul.f32 %v3482_v13, %v3482_v13 }
 0x1fd   : > { %1656 = vadd.xlane.f32.xlu1 %v1655_v41  ;;  %1653 = vadd.xlane.f32.xlu0 %v1652_v22  ;;  %v1658_v41 = vsel %vm827_vm1, %v1510_v26, 0.0  ;;  %v3486_v22 = vmul.f32 %v2357_v12, %v1227_v34  ;;  %2372 = vrcp.f32 %v1295_v28  ;;  %v1571_v26 = vsel %vm827_vm1, %v1481_v58, 0.0 }
 0x1fe   : > { %v3448_v4 = vpop.xlane.xlu1 %1174  ;;  %v3498_v55 = vmul.f32 %v2359_v56, %v1226_v9  ;;  %2374 = vrcp.f32 %v1294_v53  ;;  %v1667_v38 = vsel %vm827_vm1, %v1513_v15, 0.0  ;;  %v1664_v59 = vsel %vm827_vm1, %v1512_v23, 0.0  ;;  %v4033_v23 = vld [vmem:[#allocation3_spill] sm:$0xff] }
 0x1ff   : > { %v3450_v63 = vpop.xlane.xlu0 %1171  ;;  %v1327_v11 = vsub.f32 %v3410_v5, %v3448_v4  ;;  %v1228_v12 = vsub.f32 %v2972_v45, %v3362_v27 }
 0x200   : > { %v2361_v18 = vpop.eup %2360  ;;  %v1326_v16 = vsub.f32 %v3412_v39, %v3450_v63  ;;  %v1482_v34 = vmul.f32 %v3498_v55, %v3498_v55 }
 0x201   : > { %1566 = vadd.xlane.f32.xlu1 %v1565_v33  ;;  %1563 = vadd.xlane.f32.xlu0 %v1562_v6  ;;  %v2363_v52 = vpop.eup %2362  ;;  %v3506_v39 = vmul.f32 %v2361_v18, %v1259_v7  ;;  %2376 = vrcp.f32 %v1327_v11  ;;  %v1483_v33 = vmul.f32 %v3486_v22, %v3486_v22  ;;  %v1261_v7 = vsub.f32 %v2979_v49, %v3372_v17  ;;  %v4032_v17 = vld [vmem:[#allocation2_spill] sm:$0xff] }
 0x202   : > { %v893_v19 = vpop.xlane.xlu1 %892  ;;  %v3514_v6 = vmul.f32 %v2363_v52, %v1258_v3  ;;  %2378 = vrcp.f32 %v1326_v16  ;;  %v2365_v36 = vpop.eup %2364  ;;  %v1574_v27 = vsel %vm827_vm1, %v1482_v34, 0.0  ;;  %v1260_v11 = vsub.f32 %v2982_v50, %v3374_v0 }
 0x203   : > { %v890_v44 = vpop.xlane.xlu0 %889  ;;  %v1515_v58 = vmul.f32 %v3506_v39, %v3506_v39  ;;  %v1231_v0 = vsub.f32 %v4032_v17, %v3430_v1  ;;  %v1230_v3 = vsub.f32 %v4033_v23, %v3432_v14  ;;  %v4034_v14 = vld [vmem:[#allocation4_spill] sm:$0xff] }
 0x205   : > { %1662 = vadd.xlane.f32.xlu1 %v1661_v8  ;;  %1659 = vadd.xlane.f32.xlu0 %v1658_v41  ;;  %v2367_v8 = vpop.eup %2366  ;;  %v1229_v41 = vsub.f32 %v2969_v42, %v3360_v62  ;;  %v1514_v42 = vmul.f32 %v3514_v6, %v3514_v6  ;;  %v1673_v16 = vsel %vm827_vm1, %v1515_v58, 0.0 }
 0x206   : > { %v989_v30 = vpop.xlane.xlu1 %988  ;;  %v2369_v62 = vpop.eup %2368  ;;  %v3538_v56 = vmul.f32 %v2367_v8, %v1228_v12  ;;  %v1263_v12 = vsub.f32 %v4034_v14, %v3448_v4 }
 0x207   : > { %v986_v29 = vpop.xlane.xlu0 %985  ;;  %v3533_v61 = vmul.f32 %v2365_v36, %v1229_v41  ;;  %v2371_v9 = vpop.eup %2370  ;;  %v3550_v52 = vmul.f32 %v2369_v62, %v1261_v7 }
 0x208   : > { %v3552_v15 = vmul.f32 %v2371_v9, %v1260_v11  ;;  %v1484_v49 = vmul.f32 %v3538_v56, %v3538_v56 }
 0x209   : > { %1572 = vadd.xlane.f32.xlu1 %v1571_v26  ;;  %1569 = vadd.xlane.f32.xlu0 %v1568_v51  ;;  %v1670_v26 = vsel %vm827_vm1, %v1514_v42, 0.0  ;;  %v1517_v1 = vmul.f32 %v3550_v52, %v3550_v52 }
 0x20a   : > { %v3508_v20 = vpop.xlane.xlu1 %1084  ;;  %v2373_v51 = vpop.eup %2372  ;;  %v1580_v8 = vsel %vm827_vm1, %v1484_v49, 0.0  ;;  %v1516_v41 = vmul.f32 %v3552_v15, %v3552_v15 }
 0x20b   : > { %v3510_v5 = vpop.xlane.xlu0 %1081  ;;  %v1297_v2 = vsub.f32 %v893_v19, %v3508_v20  ;;  %v2375_v50 = vpop.eup %2374 }
 0x20c   : > { %v1296_v24 = vsub.f32 %v890_v44, %v3510_v5  ;;  %v1577_v44 = vsel %vm827_vm1, %v1483_v33, 0.0  ;;  %v3563_v34 = vmul.f32 %v2375_v50, %v1230_v3  ;;  %v1676_v4 = vsel %vm827_vm1, %v1516_v41, 0.0  ;;  %v4039_v41 = vld [vmem:[#allocation10_spill] sm:$0xff] }
 0x20d   : > { %1668 = vadd.xlane.f32.xlu1 %v1667_v38  ;;  %1665 = vadd.xlane.f32.xlu0 %v1664_v59  ;;  %2380 = vrcp.f32 %v1297_v2 }
 0x20e   : > { %v3526_v19 = vpop.xlane.xlu1 %1180  ;;  %2382 = vrcp.f32 %v1296_v24  ;;  %v2377_v36 = vpop.eup %2376  ;;  %v3560_v24 = vmul.f32 %v2373_v51, %v1231_v0 }
 0x20f   : > { %v3528_v28 = vpop.xlane.xlu0 %1177  ;;  %v1329_v53 = vsub.f32 %v989_v30, %v3526_v19  ;;  %v2379_v59 = vpop.eup %2378  ;;  %v3574_v62 = vmul.f32 %v2377_v36, %v1263_v12 }
 0x210   : > { %v1328_v45 = vsub.f32 %v986_v29, %v3528_v28  ;;  %v1485_v29 = vmul.f32 %v3533_v61, %v3533_v61  ;;  %v1487_v9 = vmul.f32 %v3560_v24, %v3560_v24  ;;  %v1264_v14 = vsub.f32 %v4039_v41, %v3528_v28  ;;  %v4042_v41 = vld [vmem:[#allocation17_spill] sm:$0xff] }
 0x211   : > { %1578 = vadd.xlane.f32.xlu1 %v1577_v44  ;;  %1575 = vadd.xlane.f32.xlu0 %v1574_v27  ;;  %2384 = vrcp.f32 %v1329_v53  ;;  %v4035_v44 = vld [vmem:[#allocation5_spill] sm:$0xff]  ;;  %v1519_v23 = vmul.f32 %v3574_v62, %v3574_v62 }
 0x212   : > { %v899_v30 = vpop.xlane.xlu1 %898  ;;  %2386 = vrcp.f32 %v1328_v45  ;;  %v1583_v38 = vsel %vm827_vm1, %v1485_v29, 0.0  ;;  %v1262_v58 = vsub.f32 %v4035_v44, %v3450_v63  ;;  %v1486_v63 = vmul.f32 %v3563_v34, %v3563_v34  ;;  %v4036_v29 = vld [vmem:[#allocation6_spill] sm:$0xff] }
 0x213   : > { %v896_v18 = vpop.xlane.xlu0 %895  ;;  %v1233_v51 = vsub.f32 %v4036_v29, %v3508_v20  ;;  %v1589_v0 = vsel %vm827_vm1, %v1487_v9, 0.0  ;;  %v4040_v29 = vld [vmem:[#allocation14_spill] sm:$0xff] }
 0x214   : > { %v3576_v45 = vmul.f32 %v2379_v59, %v1262_v58  ;;  %v1685_v58 = vsel %vm827_vm1, %v1519_v23, 0.0 }
 0x215   : > { %1674 = vadd.xlane.f32.xlu1 %v1673_v16  ;;  %1671 = vadd.xlane.f32.xlu0 %v1670_v26  ;;  %v1679_v16 = vsel %vm827_vm1, %v1517_v1, 0.0 }
 0x216   : > { %v995_v33 = vpop.xlane.xlu1 %994  ;;  %v1518_v3 = vmul.f32 %v3576_v45, %v3576_v45 }
 0x217   : > { %v992_v2 = vpop.xlane.xlu0 %991 }
 0x219   : > { %1584 = vadd.xlane.f32.xlu1 %v1583_v38  ;;  %1581 = vadd.xlane.f32.xlu0 %v1580_v8 }
 0x21a   : > { %v1091_v53 = vpop.xlane.xlu1 %1090  ;;  %v2381_v7 = vpop.eup %2380 }
 0x21b   : > { %v1088_v42 = vpop.xlane.xlu0 %1087  ;;  %v1299_v27 = vsub.f32 %v899_v30, %v1091_v53  ;;  %v2383_v26 = vpop.eup %2382  ;;  %v4037_v30 = vld [vmem:[#allocation7_spill] sm:$0xff]  ;;  %v3593_v38 = vmul.f32 %v2381_v7, %v1233_v51  ;;  %v1235_v51 = vsub.f32 %v4040_v29, %v1091_v53 }
 0x21c   : > { %v1298_v11 = vsub.f32 %v896_v18, %v1088_v42  ;;  %v1232_v49 = vsub.f32 %v4037_v30, %v3510_v5  ;;  %v1586_v5 = vsel %vm827_vm1, %v1486_v63, 0.0 }
 0x21d   : > { %2388 = vrcp.f32 %v1299_v27  ;;  %1680 = vadd.xlane.f32.xlu1 %v1679_v16  ;;  %1677 = vadd.xlane.f32.xlu0 %v1676_v4  ;;  %v1682_v27 = vsel %vm827_vm1, %v1518_v3, 0.0  ;;  %v1489_v7 = vmul.f32 %v3593_v38, %v3593_v38 }
 0x21e   : > { %2390 = vrcp.f32 %v1298_v11  ;;  %v1187_v50 = vpop.xlane.xlu1 %1186  ;;  %v2385_v36 = vpop.eup %2384  ;;  %v3595_v59 = vmul.f32 %v2383_v26, %v1232_v49  ;;  %v4041_v49 = vld [vmem:[#allocation15_spill] sm:$0xff] }
 0x21f   : > { %v1184_v18 = vpop.xlane.xlu0 %1183  ;;  %v1331_v17 = vsub.f32 %v995_v33, %v1187_v50  ;;  %v2387_v8 = vpop.eup %2386  ;;  %v4038_v33 = vld [vmem:[#allocation9_spill] sm:$0xff]  ;;  %v1595_v16 = vsel %vm827_vm1, %v1489_v7, 0.0  ;;  %v1267_v53 = vsub.f32 %v4042_v41, %v1187_v50 }
 0x220   : > { %v1330_v20 = vsub.f32 %v992_v2, %v1184_v18  ;;  %v1265_v1 = vsub.f32 %v4038_v33, %v3526_v19  ;;  %v3606_v9 = vmul.f32 %v2387_v8, %v1264_v14  ;;  %v1488_v19 = vmul.f32 %v3595_v59, %v3595_v59 }
 0x221   : > { %2392 = vrcp.f32 %v1331_v17  ;;  %1590 = vadd.xlane.f32.xlu1 %v1589_v0  ;;  %1587 = vadd.xlane.f32.xlu0 %v1586_v5  ;;  %v1234_v17 = vsub.f32 %v4041_v49, %v1088_v42 }
 0x222   : > { %2394 = vrcp.f32 %v1330_v20  ;;  %v905_v12 = vpop.xlane.xlu1 %904  ;;  %v3604_v2 = vmul.f32 %v2385_v36, %v1265_v1  ;;  %v1592_v4 = vsel %vm827_vm1, %v1488_v19, 0.0  ;;  %v1520_v26 = vmul.f32 %v3606_v9, %v3606_v9 }
 0x223   : > { %v902_v44 = vpop.xlane.xlu0 %901 }
 0x224   : > { %v1521_v63 = vmul.f32 %v3604_v2, %v3604_v2  ;;  %v1688_v1 = vsel %vm827_vm1, %v1520_v26, 0.0 }
 0x225   : > { %1686 = vadd.xlane.f32.xlu1 %v1685_v58  ;;  %1683 = vadd.xlane.f32.xlu0 %v1682_v27  ;;  %v4043_v58 = vld [vmem:[#allocation18_spill] sm:$0xff] }
 0x226   : > { %v1001_v28 = vpop.xlane.xlu1 %1000  ;;  %v1691_v33 = vsel %vm827_vm1, %v1521_v63, 0.0  ;;  %v1266_v27 = vsub.f32 %v4043_v58, %v1184_v18 }
 0x227   : > { %v998_v11 = vpop.xlane.xlu0 %997 }
 0x229   : > { %1596 = vadd.xlane.f32.xlu1 %v1595_v16  ;;  %1593 = vadd.xlane.f32.xlu0 %v1592_v4 }
 0x22a   : > { %v2389_v30 = vpop.eup %2388  ;;  %v1097_v0 = vpop.xlane.xlu1 %1096 }
 0x22b   : > { %v1094_v23 = vpop.xlane.xlu0 %1093  ;;  %v2391_v3 = vpop.eup %2390  ;;  %v3620_v36 = vmul.f32 %v2389_v30, %v1235_v51  ;;  %v1301_v20 = vsub.f32 %v905_v12, %v1097_v0 }
 0x22c   : > { %v3622_v5 = vmul.f32 %v2391_v3, %v1234_v17  ;;  %v1300_v8 = vsub.f32 %v902_v44, %v1094_v23 }
 0x22d   : > { %2396 = vrcp.f32 %v1301_v20  ;;  %1692 = vadd.xlane.f32.xlu1 %v1691_v33  ;;  %1689 = vadd.xlane.f32.xlu0 %v1688_v1  ;;  %v1491_v42 = vmul.f32 %v3620_v36, %v3620_v36  ;;  %v4044_v20 = vld [vmem:[#allocation22_spill] sm:$0xff]  ;;  %v4045_v1 = vld [vmem:[#allocation23_spill] sm:$0xff] }
 0x22e   : > { %v2393_v14 = vpop.eup %2392  ;;  %2398 = vrcp.f32 %v1300_v8  ;;  %v1193_v12 = vpop.xlane.xlu1 %1192  ;;  %v1490_v44 = vmul.f32 %v3622_v5, %v3622_v5  ;;  %v1237_v8 = vsub.f32 %v4044_v20, %v1097_v0  ;;  %v1236_v41 = vsub.f32 %v4045_v1, %v1094_v23  ;;  %v4047_v0 = vld [vmem:[#allocation25_spill] sm:$0xff] }
 0x22f   : > { %v1190_v7 = vpop.xlane.xlu0 %1189  ;;  %v2395_v19 = vpop.eup %2394  ;;  %v3632_v16 = vmul.f32 %v2393_v14, %v1267_v53  ;;  %v1333_v4 = vsub.f32 %v1001_v28, %v1193_v12  ;;  %v1601_v26 = vsel %vm827_vm1, %v1491_v42, 0.0 }
 0x230   : > { %v3634_v50 = vmul.f32 %v2395_v19, %v1266_v27  ;;  %v1332_v63 = vsub.f32 %v998_v11, %v1190_v7  ;;  %v1598_v29 = vsel %vm827_vm1, %v1490_v44, 0.0 }
 0x231   : > { %2400 = vrcp.f32 %v1333_v4  ;;  %1602 = vadd.xlane.f32.xlu1 %v1601_v26  ;;  %1599 = vadd.xlane.f32.xlu0 %v1598_v29  ;;  %v1523_v18 = vmul.f32 %v3632_v16, %v3632_v16  ;;  %v4046_v4 = vld [vmem:[#allocation24_spill] sm:$0xff] }
 0x232   : > { %2402 = vrcp.f32 %v1332_v63  ;;  %v911_v51 = vpop.xlane.xlu1 %910  ;;  %v1522_v49 = vmul.f32 %v3634_v50, %v3634_v50  ;;  %v1269_v63 = vsub.f32 %v4046_v4, %v1193_v12  ;;  %v4048_v4 = vld [vmem:[#allocation27_spill] sm:$0xff] }
 0x233   : > { %v908_v30 = vpop.xlane.xlu0 %907  ;;  %v1697_v28 = vsel %vm827_vm1, %v1523_v18, 0.0  ;;  %v1268_v18 = vsub.f32 %v4047_v0, %v1190_v7 }
 0x234   : > { %v1694_v11 = vsel %vm827_vm1, %v1522_v49, 0.0 }
 0x235   : > { %1698 = vadd.xlane.f32.xlu1 %v1697_v28  ;;  %1695 = vadd.xlane.f32.xlu0 %v1694_v11 }
 0x236   : > { %v1007_v17 = vpop.xlane.xlu1 %1006 }
 0x237   : > { %v1004_v3 = vpop.xlane.xlu0 %1003 }
 0x23a   : > { %v2397_v33 = vpop.eup %2396  ;;  %v1103_v53 = vpop.xlane.xlu1 %1102 }
 0x23b   : > { %v1100_v42 = vpop.xlane.xlu0 %1099  ;;  %v2399_v14 = vpop.eup %2398  ;;  %v3646_v58 = vmul.f32 %v2397_v33, %v1237_v8  ;;  %v1303_v27 = vsub.f32 %v911_v51, %v1103_v53 }
 0x23c   : > { %v3648_v44 = vmul.f32 %v2399_v14, %v1236_v41  ;;  %v1302_v19 = vsub.f32 %v908_v30, %v1100_v42 }
 0x23d   : > { %2404 = vrcp.f32 %v1303_v27  ;;  %v1493_v26 = vmul.f32 %v3646_v58, %v3646_v58 }
 0x23e   : > { %v2401_v29 = vpop.eup %2400  ;;  %2406 = vrcp.f32 %v1302_v19  ;;  %v1199_v23 = vpop.xlane.xlu1 %1198  ;;  %v1492_v28 = vmul.f32 %v3648_v44, %v3648_v44 }
 0x23f   : > { %v1196_v49 = vpop.xlane.xlu0 %1195  ;;  %v2403_v11 = vpop.eup %2402  ;;  %v3656_v51 = vmul.f32 %v2401_v29, %v1269_v63  ;;  %v1335_v20 = vsub.f32 %v1007_v17, %v1199_v23  ;;  %v1607_v8 = vsel %vm827_vm1, %v1493_v26, 0.0  ;;  %v1239_v63 = vsub.f32 %v4048_v4, %v1103_v53  ;;  %v4049_v29 = vld [vmem:[#allocation28_spill] sm:$0xff]  ;;  %v4053_v53 = vld [vmem:[#allocation30_spill] sm:$0xff] }
 0x240   : > { %v3658_v30 = vmul.f32 %v2403_v11, %v1268_v18  ;;  %v1334_v12 = vsub.f32 %v1004_v3, %v1196_v49  ;;  %v1604_v33 = vsel %vm827_vm1, %v1492_v28, 0.0  ;;  %1608 = vadd.xlane.f32.xlu1 %v1607_v8  ;;  %v1238_v0 = vsub.f32 %v4049_v29, %v1100_v42 }
 0x241   : > { %2408 = vrcp.f32 %v1335_v20  ;;  %1605 = vadd.xlane.f32.xlu0 %v1604_v33  ;;  %v1525_v7 = vmul.f32 %v3656_v51, %v3656_v51  ;;  %v1270_v4 = vsub.f32 %v4053_v53, %v1196_v49  ;;  %v4056_v53 = vld [vmem:[#allocation32_spill] sm:$0xff] }
 0x242   : > { %2410 = vrcp.f32 %v1334_v12  ;;  %v917_v1 = vpop.xlane.xlu1 %916  ;;  %v1524_v14 = vmul.f32 %v3658_v30, %v3658_v30 }
 0x243   : > { %v914_v41 = vpop.xlane.xlu0 %913  ;;  %v1703_v17 = vsel %vm827_vm1, %v1525_v7, 0.0  ;;  %v4052_v7 = vld [vmem:[#allocation29_spill] sm:$0xff] }
 0x244   : > { %v1700_v3 = vsel %vm827_vm1, %v1524_v14, 0.0  ;;  %1704 = vadd.xlane.f32.xlu1 %v1703_v17  ;;  %v1271_v14 = vsub.f32 %v4052_v7, %v1199_v23 }
 0x245   : > { %1701 = vadd.xlane.f32.xlu0 %v1700_v3 }
 0x246   : > { %v1013_v27 = vpop.xlane.xlu1 %1012 }
 0x247   : > { %v1010_v19 = vpop.xlane.xlu0 %1009 }
 0x24a   : > { %v2405_v26 = vpop.eup %2404  ;;  %v1109_v18 = vpop.xlane.xlu1 %1108 }
 0x24b   : > { %v1106_v28 = vpop.xlane.xlu0 %1105  ;;  %v2407_v11 = vpop.eup %2406  ;;  %v3670_v20 = vmul.f32 %v2405_v26, %v1239_v63  ;;  %v1305_v12 = vsub.f32 %v917_v1, %v1109_v18 }
 0x24c   : > { %v3672_v8 = vmul.f32 %v2407_v11, %v1238_v0  ;;  %v1304_v33 = vsub.f32 %v914_v41, %v1106_v28 }
 0x24d   : > { %4050 = vst [vmem:[#allocation2_spill] sm:$0xff] %v3670_v20  ;;  %2412 = vrcp.f32 %v1305_v12  ;;  %v1495_v17 = vmul.f32 %v3670_v20, %v3670_v20  ;;  %v4058_v20 = vld [vmem:[#allocation34_spill] sm:$0xff] }
 0x24e   : > { %4051 = vst [vmem:[#allocation3_spill] sm:$0xff] %v3672_v8  ;;  %v2409_v3 = vpop.eup %2408  ;;  %2414 = vrcp.f32 %v1304_v33  ;;  %v1205_v42 = vpop.xlane.xlu1 %1204  ;;  %v1494_v63 = vmul.f32 %v3672_v8, %v3672_v8 }
 0x24f   : > { %v1202_v29 = vpop.xlane.xlu0 %1201  ;;  %v2411_v26 = vpop.eup %2410  ;;  %v3680_v1 = vmul.f32 %v2409_v3, %v1271_v14  ;;  %v1337_v0 = vsub.f32 %v1013_v27, %v1205_v42  ;;  %v1613_v11 = vsel %vm827_vm1, %v1495_v17, 0.0 }
 0x250   : > { %v3682_v41 = vmul.f32 %v2411_v26, %v1270_v4  ;;  %v1336_v23 = vsub.f32 %v1010_v19, %v1202_v29  ;;  %v1610_v12 = vsel %vm827_vm1, %v1494_v63, 0.0  ;;  %1614 = vadd.xlane.f32.xlu1 %v1613_v11  ;;  %v1241_v4 = vsub.f32 %v4056_v53, %v1109_v18  ;;  %v4057_v26 = vld [vmem:[#allocation33_spill] sm:$0xff]  ;;  %v4059_v18 = vld [vmem:[#allocation35_spill] sm:$0xff] }
 0x251   : > { %4054 = vst [vmem:[#allocation4_spill] sm:$0xff] %v3680_v1  ;;  %2416 = vrcp.f32 %v1337_v0  ;;  %1611 = vadd.xlane.f32.xlu0 %v1610_v12  ;;  %v1527_v49 = vmul.f32 %v3680_v1, %v3680_v1  ;;  %v1240_v0 = vsub.f32 %v4057_v26, %v1106_v28  ;;  %v1272_v53 = vsub.f32 %v4059_v18, %v1202_v29 }
 0x252   : > { %4055 = vst [vmem:[#allocation5_spill] sm:$0xff] %v3682_v41  ;;  %2418 = vrcp.f32 %v1336_v23  ;;  %v923_v33 = vpop.xlane.xlu1 %922  ;;  %v1526_v14 = vmul.f32 %v3682_v41, %v3682_v41 }
 0x253   : > { %v920_v7 = vpop.xlane.xlu0 %919  ;;  %v1709_v27 = vsel %vm827_vm1, %v1527_v49, 0.0 }
 0x254   : > { %v1706_v19 = vsel %vm827_vm1, %v1526_v14, 0.0  ;;  %1710 = vadd.xlane.f32.xlu1 %v1709_v27  ;;  %v1273_v14 = vsub.f32 %v4058_v20, %v1205_v42 }
 0x255   : > { %1707 = vadd.xlane.f32.xlu0 %v1706_v19 }
 0x256   : > { %v1019_v17 = vpop.xlane.xlu1 %1018 }
 0x257   : > { %v1016_v3 = vpop.xlane.xlu0 %1015 }
 0x25a   : > { %v2413_v63 = vpop.eup %2412  ;;  %v1115_v11 = vpop.xlane.xlu1 %1114 }
 0x25b   : > { %v1112_v23 = vpop.xlane.xlu0 %1111  ;;  %v2415_v12 = vpop.eup %2414  ;;  %v3694_v1 = vmul.f32 %v2413_v63, %v1241_v4  ;;  %v1307_v8 = vsub.f32 %v923_v33, %v1115_v11 }
 0x25c   : > { %v3696_v41 = vmul.f32 %v2415_v12, %v1240_v0  ;;  %v1306_v49 = vsub.f32 %v920_v7, %v1112_v23 }
 0x25d   : > { %2420 = vrcp.f32 %v1307_v8  ;;  %v1497_v27 = vmul.f32 %v3694_v1, %v3694_v1 }
 0x25e   : > { %v2417_v19 = vpop.eup %2416  ;;  %2422 = vrcp.f32 %v1306_v49  ;;  %v1211_v28 = vpop.xlane.xlu1 %1210  ;;  %v1496_v4 = vmul.f32 %v3696_v41, %v3696_v41 }
 0x25f   : > { %v1208_v26 = vpop.xlane.xlu0 %1207  ;;  %v2419_v63 = vpop.eup %2418  ;;  %v3704_v33 = vmul.f32 %v2417_v19, %v1273_v14  ;;  %v1339_v0 = vsub.f32 %v1019_v17, %v1211_v28  ;;  %v1619_v8 = vsel %vm827_vm1, %v1497_v27, 0.0 }
 0x260   : > { %v3706_v7 = vmul.f32 %v2419_v63, %v1272_v53  ;;  %v1338_v20 = vsub.f32 %v1016_v3, %v1208_v26  ;;  %v1616_v42 = vsel %vm827_vm1, %v1496_v4, 0.0  ;;  %1620 = vadd.xlane.f32.xlu1 %v1619_v8 }
 0x261   : > { %4060 = vst [vmem:[#allocation6_spill] sm:$0xff] %v3704_v33  ;;  %2424 = vrcp.f32 %v1339_v0  ;;  %1617 = vadd.xlane.f32.xlu0 %v1616_v42  ;;  %v1529_v29 = vmul.f32 %v3704_v33, %v3704_v33  ;;  %v4062_v0 = vld [vmem:[#allocation38_spill] sm:$0xff]  ;;  %v4063_v42 = vld [vmem:[#allocation39_spill] sm:$0xff] }
 0x262   : > { %4061 = vst [vmem:[#allocation7_spill] sm:$0xff] %v3706_v7  ;;  %2426 = vrcp.f32 %v1338_v20  ;;  %v1537_v12 = vpop.xlane.xlu1 %1536  ;;  %v1528_v14 = vmul.f32 %v3706_v7, %v3706_v7  ;;  %v1243_v20 = vsub.f32 %v4062_v0, %v1115_v11  ;;  %v1242_v7 = vsub.f32 %v4063_v42, %v1112_v23 }
 0x263   : > { %v1534_v49 = vpop.xlane.xlu0 %1533  ;;  %v1725_v17 = vmax.f32 %v1537_v12, 1e-24  ;;  %v1715_v3 = vsel %vm827_vm1, %v1529_v29, 0.0 }
 0x264   : > { %v1724_v19 = vmax.f32 %v1534_v49, 1e-24  ;;  %v1712_v27 = vsel %vm827_vm1, %v1528_v14, 0.0  ;;  %1716 = vadd.xlane.f32.xlu1 %v1715_v3 }
 0x265   : > { %2428 = vrsqrt.f32 %v1725_v17  ;;  %1713 = vadd.xlane.f32.xlu0 %v1712_v27 }
 0x266   : > { %2430 = vrsqrt.f32 %v1724_v19  ;;  %v1633_v18 = vpop.xlane.xlu1 %1632  ;;  %v4064_v19 = vld [vmem:[#allocation40_spill] sm:$0xff] }
 0x267   : > { %v1630_v53 = vpop.xlane.xlu0 %1629  ;;  %v1757_v4 = vmax.f32 %v1633_v18, 1e-24  ;;  %v1275_v27 = vsub.f32 %v4064_v19, %v1211_v28 }
 0x268   : > { %v1756_v63 = vmax.f32 %v1630_v53, 1e-24  ;;  %v4065_v53 = vld [vmem:[#allocation41_spill] sm:$0xff] }
 0x269   : > { %2432 = vrsqrt.f32 %v1757_v4  ;;  %v1274_v4 = vsub.f32 %v4065_v53, %v1208_v26 }
 0x26a   : > { %v2421_v8 = vpop.eup %2420  ;;  %2434 = vrsqrt.f32 %v1756_v63  ;;  %v1543_v12 = vpop.xlane.xlu1 %1542 }
 0x26b   : > { %v1540_v49 = vpop.xlane.xlu0 %1539  ;;  %v2423_v29 = vpop.eup %2422  ;;  %v3718_v33 = vmul.f32 %v2421_v8, %v1243_v20  ;;  %v1727_v14 = vmax.f32 %v1543_v12, 1e-24 }
 0x26c   : > { %v1726_v17 = vmax.f32 %v1540_v49, 1e-24  ;;  %v3720_v3 = vmul.f32 %v2423_v29, %v1242_v7 }
 0x26d   : > { %2436 = vrsqrt.f32 %v1727_v14  ;;  %v1499_v11 = vmul.f32 %v3718_v33, %v3718_v33 }
 0x26e   : > { %v2425_v18 = vpop.eup %2424  ;;  %2438 = vrsqrt.f32 %v1726_v17  ;;  %v1639_v23 = vpop.xlane.xlu1 %1638  ;;  %v1498_v0 = vmul.f32 %v3720_v3, %v3720_v3 }
 0x26f   : > { %v1636_v63 = vpop.xlane.xlu0 %1635  ;;  %v2427_v20 = vpop.eup %2426  ;;  %v3728_v8 = vmul.f32 %v2425_v18, %v1275_v27  ;;  %v1759_v7 = vmax.f32 %v1639_v23, 1e-24  ;;  %v1625_v28 = vsel %vm827_vm1, %v1499_v11, 0.0  ;;  %v4066_v11 = vld [vmem:[#allocation8_spill] sm:$0xff] }
 0x270   : > { %v1758_v42 = vmax.f32 %v1636_v63, 1e-24  ;;  %v3731_v12 = vmul.f32 %v2427_v20, %v1274_v4  ;;  %1626 = vadd.xlane.f32.xlu1 %v1625_v28  ;;  %v1622_v49 = vsel %vm827_vm1, %v1498_v0, 0.0  ;;  %v4067_v63 = vld [vmem:[#allocation12_spill] sm:$0xff] }
 0x271   : > { %2440 = vrsqrt.f32 %v1759_v7  ;;  %1623 = vadd.xlane.f32.xlu0 %v1622_v49  ;;  %v1531_v26 = vmul.f32 %v3728_v8, %v3728_v8 }
 0x272   : > { %v2429_v29 = vpop.eup %2428  ;;  %2442 = vrsqrt.f32 %v1758_v42  ;;  %v1549_v14 = vpop.xlane.xlu1 %1548  ;;  %v1530_v19 = vmul.f32 %v3731_v12, %v3731_v12 }
 0x273   : > { %v1546_v17 = vpop.xlane.xlu0 %1545  ;;  %v2431_v27 = vpop.eup %2430  ;;  %v1853_v18 = vmul.f32 %v2429_v29, %v4066_v11  ;;  %v1729_v53 = vmax.f32 %v1549_v14, 1e-24  ;;  %v1721_v23 = vsel %vm827_vm1, %v1531_v26, 0.0  ;;  %v4068_v29 = vld [vmem:[#allocation11_spill] sm:$0xff] }
 0x274   : > { %v1728_v4 = vmax.f32 %v1546_v17, 1e-24  ;;  %v1852_v0 = vmul.f32 %v2431_v27, %v4067_v63  ;;  %1722 = vadd.xlane.f32.xlu1 %v1721_v23  ;;  %v1718_v20 = vsel %vm827_vm1, %v1530_v19, 0.0  ;;  %v4069_v27 = vld [vmem:[#allocation13_spill] sm:$0xff]  ;;  %v4070_v23 = vld [vmem:[#allocation16_spill] sm:$0xff] }
 0x275   : > { %1917 = vst.msk [vmem:[%s3741_s6 + $0x8] sm:$0xff] %vm827_vm1, %v1853_v18  ;;  %2444 = vrsqrt.f32 %v1729_v53  ;;  %1719 = vadd.xlane.f32.xlu0 %v1718_v20 }
 0x276   : > { %v2433_v7 = vpop.eup %2432  ;;  %1916 = vst.msk [vmem:[%s3741_s6] sm:$0xff] %vm827_vm1, %v1852_v0  ;;  %2446 = vrsqrt.f32 %v1728_v4  ;;  %v1645_v42 = vpop.xlane.xlu1 %1644 }
 0x277   : > { %v1642_v28 = vpop.xlane.xlu0 %1641  ;;  %v2435_v49 = vpop.eup %2434  ;;  %v1885_v26 = vmul.f32 %v2433_v7, %v4068_v29  ;;  %v1761_v14 = vmax.f32 %v1645_v42, 1e-24  ;;  %v4071_v7 = vld [vmem:[#allocation21_spill] sm:$0xff] }
 0x278   : > { %v1760_v17 = vmax.f32 %v1642_v28, 1e-24  ;;  %v1884_v11 = vmul.f32 %v2435_v49, %v4069_v27 }
 0x279   : > { %1949 = vst.msk [vmem:[%s3741_s6 + $0x108] sm:$0xff] %vm827_vm1, %v1885_v26  ;;  %2448 = vrsqrt.f32 %v1761_v14  ;;  %v4072_v14 = vld [vmem:[#allocation19_spill] sm:$0xff] }
 0x27a   : > { %v2437_v19 = vpop.eup %2436  ;;  %1948 = vst.msk [vmem:[%s3741_s6 + $0x100] sm:$0xff] %vm827_vm1, %v1884_v11  ;;  %2450 = vrsqrt.f32 %v1760_v17  ;;  %v1555_v18 = vpop.xlane.xlu1 %1554 }
 0x27b   : > { %v1552_v53 = vpop.xlane.xlu0 %1551  ;;  %v2439_v4 = vpop.eup %2438  ;;  %v1855_v63 = vmul.f32 %v2437_v19, %v4070_v23  ;;  %v1731_v0 = vmax.f32 %v1555_v18, 1e-24  ;;  %v4073_v19 = vld [vmem:[#allocation20_spill] sm:$0xff] }
 0x27c   : > { %v1730_v20 = vmax.f32 %v1552_v53, 1e-24  ;;  %v1854_v42 = vmul.f32 %v2439_v4, %v4071_v7 }
 0x27d   : > { %1919 = vst.msk [vmem:[%s3741_s6 + $0x18] sm:$0xff] %vm827_vm1, %v1855_v63  ;;  %2452 = vrsqrt.f32 %v1731_v0  ;;  %v4074_v0 = vld [vmem:[#allocation26_spill] sm:$0xff] }
 0x27e   : > { %v2441_v28 = vpop.eup %2440  ;;  %1918 = vst.msk [vmem:[%s3741_s6 + $0x10] sm:$0xff] %vm827_vm1, %v1854_v42  ;;  %2454 = vrsqrt.f32 %v1730_v20  ;;  %v1651_v49 = vpop.xlane.xlu1 %1650 }
 0x27f   : > { %v1648_v29 = vpop.xlane.xlu0 %1647  ;;  %v2443_v26 = vpop.eup %2442  ;;  %v1887_v17 = vmul.f32 %v2441_v28, %v4072_v14  ;;  %v1763_v27 = vmax.f32 %v1651_v49, 1e-24 }
 0x280   : > { %v1762_v11 = vmax.f32 %v1648_v29, 1e-24  ;;  %v1886_v18 = vmul.f32 %v2443_v26, %v4073_v19 }
 0x281   : > { %1951 = vst.msk [vmem:[%s3741_s6 + $0x118] sm:$0xff] %vm827_vm1, %v1887_v17  ;;  %2456 = vrsqrt.f32 %v1763_v27 }
 0x282   : > { %v2445_v53 = vpop.eup %2444  ;;  %1950 = vst.msk [vmem:[%s3741_s6 + $0x110] sm:$0xff] %vm827_vm1, %v1886_v18  ;;  %2458 = vrsqrt.f32 %v1762_v11  ;;  %v1561_v4 = vpop.xlane.xlu1 %1560 }
 0x283   : > { %v1558_v23 = vpop.xlane.xlu0 %1557  ;;  %v2447_v63 = vpop.eup %2446  ;;  %v1857_v20 = vmul.f32 %v2445_v53, %v4074_v0  ;;  %v1733_v7 = vmax.f32 %v1561_v4, 1e-24 }
 0x284   : > { %v1732_v42 = vmax.f32 %v1558_v23, 1e-24  ;;  %v1856_v28 = vmul.f32 %v2447_v63, %v3132_v47 }
 0x285   : > { %1921 = vst.msk [vmem:[%s3741_s6 + $0x28] sm:$0xff] %vm827_vm1, %v1857_v20  ;;  %2460 = vrsqrt.f32 %v1733_v7 }
 0x286   : > { %v2449_v49 = vpop.eup %2448  ;;  %1920 = vst.msk [vmem:[%s3741_s6 + $0x20] sm:$0xff] %vm827_vm1, %v1856_v28  ;;  %2462 = vrsqrt.f32 %v1732_v42  ;;  %v1657_v29 = vpop.xlane.xlu1 %1656 }
 0x287   : > { %v1654_v26 = vpop.xlane.xlu0 %1653  ;;  %v2451_v14 = vpop.eup %2450  ;;  %v1889_v17 = vmul.f32 %v2449_v49, %v3140_v57  ;;  %v1765_v27 = vmax.f32 %v1657_v29, 1e-24  ;;  %v4075_v29 = vld [vmem:[#allocation31_spill] sm:$0xff] }
 0x288   : > { %v1764_v11 = vmax.f32 %v1654_v26, 1e-24  ;;  %v1888_v19 = vmul.f32 %v2451_v14, %v3142_v10 }
 0x289   : > { %1953 = vst.msk [vmem:[%s3741_s6 + $0x128] sm:$0xff] %vm827_vm1, %v1889_v17  ;;  %2464 = vrsqrt.f32 %v1765_v27 }
 0x28a   : > { %v2453_v47 = vpop.eup %2452  ;;  %1952 = vst.msk [vmem:[%s3741_s6 + $0x120] sm:$0xff] %vm827_vm1, %v1888_v19  ;;  %2466 = vrsqrt.f32 %v1764_v11  ;;  %v1567_v18 = vpop.xlane.xlu1 %1566  ;;  %v4076_v11 = vld [vmem:[#allocation36_spill] sm:$0xff] }
 0x28b   : > { %v1564_v53 = vpop.xlane.xlu0 %1563  ;;  %v2455_v4 = vpop.eup %2454  ;;  %v1859_v23 = vmul.f32 %v2453_v47, %v3170_v21  ;;  %v1735_v57 = vmax.f32 %v1567_v18, 1e-24  ;;  %v4077_v18 = vld [vmem:[#allocation37_spill] sm:$0xff] }
 0x28c   : > { %v1734_v63 = vmax.f32 %v1564_v53, 1e-24  ;;  %v1858_v0 = vmul.f32 %v2455_v4, %v3172_v46 }
 0x28d   : > { %1923 = vst.msk [vmem:[%s3741_s6 + $0x38] sm:$0xff] %vm827_vm1, %v1859_v23  ;;  %2468 = vrsqrt.f32 %v1735_v57 }
 0x28e   : > { %v2457_v10 = vpop.eup %2456  ;;  %1922 = vst.msk [vmem:[%s3741_s6 + $0x30] sm:$0xff] %vm827_vm1, %v1858_v0  ;;  %2470 = vrsqrt.f32 %v1734_v63  ;;  %v1663_v20 = vpop.xlane.xlu1 %1662 }
 0x28f   : > { %v1660_v7 = vpop.xlane.xlu0 %1659  ;;  %v2459_v42 = vpop.eup %2458  ;;  %v1891_v28 = vmul.f32 %v2457_v10, %v3180_v35  ;;  %v1767_v21 = vmax.f32 %v1663_v20, 1e-24 }
 0x290   : > { %v1766_v49 = vmax.f32 %v1660_v7, 1e-24  ;;  %v1890_v26 = vmul.f32 %v2459_v42, %v4075_v29 }
 0x291   : > { %1955 = vst.msk [vmem:[%s3741_s6 + $0x138] sm:$0xff] %vm827_vm1, %v1891_v28  ;;  %2472 = vrsqrt.f32 %v1767_v21 }
 0x292   : > { %v2461_v46 = vpop.eup %2460  ;;  %1954 = vst.msk [vmem:[%s3741_s6 + $0x130] sm:$0xff] %vm827_vm1, %v1890_v26  ;;  %2474 = vrsqrt.f32 %v1766_v49  ;;  %v1573_v14 = vpop.xlane.xlu1 %1572 }
 0x293   : > { %v1570_v17 = vpop.xlane.xlu0 %1569  ;;  %v2463_v27 = vpop.eup %2462  ;;  %v1861_v19 = vmul.f32 %v2461_v46, %v4076_v11  ;;  %v1737_v35 = vmax.f32 %v1573_v14, 1e-24 }
 0x294   : > { %v1736_v47 = vmax.f32 %v1570_v17, 1e-24  ;;  %v1860_v53 = vmul.f32 %v2463_v27, %v4077_v18 }
 0x295   : > { %1925 = vst.msk [vmem:[%s3741_s6 + $0x48] sm:$0xff] %vm827_vm1, %v1861_v19  ;;  %2476 = vrsqrt.f32 %v1737_v35 }
 0x296   : > { %v2465_v4 = vpop.eup %2464  ;;  %1924 = vst.msk [vmem:[%s3741_s6 + $0x40] sm:$0xff] %vm827_vm1, %v1860_v53  ;;  %2478 = vrsqrt.f32 %v1736_v47  ;;  %v1669_v23 = vpop.xlane.xlu1 %1668 }
 0x297   : > { %v1666_v57 = vpop.xlane.xlu0 %1665  ;;  %v2467_v63 = vpop.eup %2466  ;;  %v1893_v0 = vmul.f32 %v2465_v4, %v3236_v60  ;;  %v1769_v10 = vmax.f32 %v1669_v23, 1e-24 }
 0x298   : > { %v1768_v20 = vmax.f32 %v1666_v57, 1e-24  ;;  %v1892_v7 = vmul.f32 %v2467_v63, %v3238_v54 }
 0x299   : > { %1957 = vst.msk [vmem:[%s3741_s6 + $0x148] sm:$0xff] %vm827_vm1, %v1893_v0  ;;  %2480 = vrsqrt.f32 %v1769_v10 }
 0x29a   : > { %v2469_v42 = vpop.eup %2468  ;;  %1956 = vst.msk [vmem:[%s3741_s6 + $0x140] sm:$0xff] %vm827_vm1, %v1892_v7  ;;  %2482 = vrsqrt.f32 %v1768_v20  ;;  %v1579_v28 = vpop.xlane.xlu1 %1578 }
 0x29b   : > { %v1576_v21 = vpop.xlane.xlu0 %1575  ;;  %v2471_v49 = vpop.eup %2470  ;;  %v1863_v29 = vmul.f32 %v2469_v42, %v3420_v37  ;;  %v1739_v60 = vmax.f32 %v1579_v28, 1e-24 }
 0x29c   : > { %v1738_v26 = vmax.f32 %v1576_v21, 1e-24  ;;  %v1862_v46 = vmul.f32 %v2471_v49, %v3422_v48 }
 0x29d   : > { %1927 = vst.msk [vmem:[%s3741_s6 + $0x58] sm:$0xff] %vm827_vm1, %v1863_v29  ;;  %2484 = vrsqrt.f32 %v1739_v60 }
 0x29e   : > { %v2473_v54 = vpop.eup %2472  ;;  %1926 = vst.msk [vmem:[%s3741_s6 + $0x50] sm:$0xff] %vm827_vm1, %v1862_v46  ;;  %2486 = vrsqrt.f32 %v1738_v26  ;;  %v1675_v14 = vpop.xlane.xlu1 %1674 }
 0x29f   : > { %v1672_v17 = vpop.xlane.xlu0 %1671  ;;  %v2475_v27 = vpop.eup %2474  ;;  %v1895_v11 = vmul.f32 %v2473_v54, %v3426_v25  ;;  %v1771_v37 = vmax.f32 %v1675_v14, 1e-24 }
 0x2a0   : > { %v1770_v19 = vmax.f32 %v1672_v17, 1e-24  ;;  %v1894_v35 = vmul.f32 %v2475_v27, %v3428_v43 }
 0x2a1   : > { %1959 = vst.msk [vmem:[%s3741_s6 + $0x158] sm:$0xff] %vm827_vm1, %v1895_v11  ;;  %2488 = vrsqrt.f32 %v1771_v37 }
 0x2a2   : > { %v2477_v48 = vpop.eup %2476  ;;  %1958 = vst.msk [vmem:[%s3741_s6 + $0x150] sm:$0xff] %vm827_vm1, %v1894_v35  ;;  %2490 = vrsqrt.f32 %v1770_v19  ;;  %v1585_v47 = vpop.xlane.xlu1 %1584 }
 0x2a3   : > { %v1582_v18 = vpop.xlane.xlu0 %1581  ;;  %v2479_v53 = vpop.eup %2478  ;;  %v1865_v4 = vmul.f32 %v2477_v48, %v3456_v31  ;;  %v1741_v25 = vmax.f32 %v1585_v47, 1e-24 }
 0x2a4   : > { %v1740_v23 = vmax.f32 %v1582_v18, 1e-24  ;;  %v1864_v57 = vmul.f32 %v2479_v53, %v3458_v32 }
 0x2a5   : > { %1929 = vst.msk [vmem:[%s3741_s6 + $0x68] sm:$0xff] %vm827_vm1, %v1865_v4  ;;  %2492 = vrsqrt.f32 %v1741_v25 }
 0x2a6   : > { %v2481_v43 = vpop.eup %2480  ;;  %1928 = vst.msk [vmem:[%s3741_s6 + $0x60] sm:$0xff] %vm827_vm1, %v1864_v57  ;;  %2494 = vrsqrt.f32 %v1740_v23  ;;  %v1681_v63 = vpop.xlane.xlu1 %1680 }
 0x2a7   : > { %v1678_v0 = vpop.xlane.xlu0 %1677  ;;  %v2483_v10 = vpop.eup %2482  ;;  %v1897_v20 = vmul.f32 %v2481_v43, %v3480_v40  ;;  %v1773_v31 = vmax.f32 %v1681_v63, 1e-24 }
 0x2a8   : > { %v1772_v7 = vmax.f32 %v1678_v0, 1e-24  ;;  %v1896_v42 = vmul.f32 %v2483_v10, %v3482_v13 }
 0x2a9   : > { %1961 = vst.msk [vmem:[%s3741_s6 + $0x168] sm:$0xff] %vm827_vm1, %v1897_v20  ;;  %2496 = vrsqrt.f32 %v1773_v31 }
 0x2aa   : > { %v2485_v32 = vpop.eup %2484  ;;  %1960 = vst.msk [vmem:[%s3741_s6 + $0x160] sm:$0xff] %vm827_vm1, %v1896_v42  ;;  %2498 = vrsqrt.f32 %v1772_v7  ;;  %v1591_v28 = vpop.xlane.xlu1 %1590 }
 0x2ab   : > { %v1588_v21 = vpop.xlane.xlu0 %1587  ;;  %v2487_v49 = vpop.eup %2486  ;;  %v1867_v29 = vmul.f32 %v2485_v32, %v3486_v22  ;;  %v1743_v40 = vmax.f32 %v1591_v28, 1e-24 }
 0x2ac   : > { %v1742_v60 = vmax.f32 %v1588_v21, 1e-24  ;;  %v1866_v26 = vmul.f32 %v2487_v49, %v3498_v55 }
 0x2ad   : > { %1931 = vst.msk [vmem:[%s3741_s6 + $0x78] sm:$0xff] %vm827_vm1, %v1867_v29  ;;  %2500 = vrsqrt.f32 %v1743_v40 }
 0x2ae   : > { %v2489_v13 = vpop.eup %2488  ;;  %1930 = vst.msk [vmem:[%s3741_s6 + $0x70] sm:$0xff] %vm827_vm1, %v1866_v26  ;;  %2502 = vrsqrt.f32 %v1742_v60  ;;  %v1687_v46 = vpop.xlane.xlu1 %1686 }
 0x2af   : > { %v1684_v54 = vpop.xlane.xlu0 %1683  ;;  %v2491_v14 = vpop.eup %2490  ;;  %v1899_v17 = vmul.f32 %v2489_v13, %v3506_v39  ;;  %v1775_v22 = vmax.f32 %v1687_v46, 1e-24 }
 0x2b0   : > { %v1774_v27 = vmax.f32 %v1684_v54, 1e-24  ;;  %v1898_v11 = vmul.f32 %v2491_v14, %v3514_v6 }
 0x2b1   : > { %1963 = vst.msk [vmem:[%s3741_s6 + $0x178] sm:$0xff] %vm827_vm1, %v1899_v17  ;;  %2504 = vrsqrt.f32 %v1775_v22 }
 0x2b2   : > { %v2493_v55 = vpop.eup %2492  ;;  %1962 = vst.msk [vmem:[%s3741_s6 + $0x170] sm:$0xff] %vm827_vm1, %v1898_v11  ;;  %2506 = vrsqrt.f32 %v1774_v27  ;;  %v1597_v37 = vpop.xlane.xlu1 %1596 }
 0x2b3   : > { %v1594_v19 = vpop.xlane.xlu0 %1593  ;;  %v2495_v35 = vpop.eup %2494  ;;  %v1869_v48 = vmul.f32 %v2493_v55, %v3533_v61  ;;  %v1745_v39 = vmax.f32 %v1597_v37, 1e-24 }
 0x2b4   : > { %v1744_v47 = vmax.f32 %v1594_v19, 1e-24  ;;  %v1868_v18 = vmul.f32 %v2495_v35, %v3538_v56 }
 0x2b5   : > { %1933 = vst.msk [vmem:[%s3741_s6 + $0x88] sm:$0xff] %vm827_vm1, %v1869_v48  ;;  %2508 = vrsqrt.f32 %v1745_v39 }
 0x2b6   : > { %v2497_v6 = vpop.eup %2496  ;;  %1932 = vst.msk [vmem:[%s3741_s6 + $0x80] sm:$0xff] %vm827_vm1, %v1868_v18  ;;  %2510 = vrsqrt.f32 %v1744_v47  ;;  %v1693_v53 = vpop.xlane.xlu1 %1692 }
 0x2b7   : > { %v1690_v4 = vpop.xlane.xlu0 %1689  ;;  %v2499_v25 = vpop.eup %2498  ;;  %v1901_v23 = vmul.f32 %v2497_v6, %v3550_v52  ;;  %v1777_v61 = vmax.f32 %v1693_v53, 1e-24 }
 0x2b8   : > { %v1776_v57 = vmax.f32 %v1690_v4, 1e-24  ;;  %v1900_v43 = vmul.f32 %v2499_v25, %v3552_v15 }
 0x2b9   : > { %1965 = vst.msk [vmem:[%s3741_s6 + $0x188] sm:$0xff] %vm827_vm1, %v1901_v23  ;;  %2512 = vrsqrt.f32 %v1777_v61 }
 0x2ba   : > { %v2501_v56 = vpop.eup %2500  ;;  %1964 = vst.msk [vmem:[%s3741_s6 + $0x180] sm:$0xff] %vm827_vm1, %v1900_v43  ;;  %2514 = vrsqrt.f32 %v1776_v57  ;;  %v1603_v63 = vpop.xlane.xlu1 %1602 }
 0x2bb   : > { %v1600_v0 = vpop.xlane.xlu0 %1599  ;;  %v2503_v10 = vpop.eup %2502  ;;  %v1871_v20 = vmul.f32 %v2501_v56, %v3560_v24  ;;  %v1747_v52 = vmax.f32 %v1603_v63, 1e-24 }
 0x2bc   : > { %v1746_v31 = vmax.f32 %v1600_v0, 1e-24  ;;  %v1870_v7 = vmul.f32 %v2503_v10, %v3563_v34 }
 0x2bd   : > { %1935 = vst.msk [vmem:[%s3741_s6 + $0x98] sm:$0xff] %vm827_vm1, %v1871_v20  ;;  %2516 = vrsqrt.f32 %v1747_v52  ;;  %v4078_v20 = vld [vmem:[#allocation2_spill] sm:$0xff] }
 0x2be   : > { %v2505_v15 = vpop.eup %2504  ;;  %1934 = vst.msk [vmem:[%s3741_s6 + $0x90] sm:$0xff] %vm827_vm1, %v1870_v7  ;;  %2518 = vrsqrt.f32 %v1746_v31  ;;  %v1699_v42 = vpop.xlane.xlu1 %1698  ;;  %v4079_v7 = vld [vmem:[#allocation3_spill] sm:$0xff] }
 0x2bf   : > { %v1696_v32 = vpop.xlane.xlu0 %1695  ;;  %v2507_v28 = vpop.eup %2506  ;;  %v1903_v24 = vmul.f32 %v2505_v15, %v3574_v62  ;;  %v1779_v21 = vmax.f32 %v1699_v42, 1e-24 }
 0x2c0   : > { %v1778_v49 = vmax.f32 %v1696_v32, 1e-24  ;;  %v1902_v34 = vmul.f32 %v2507_v28, %v3576_v45 }
 0x2c1   : > { %1967 = vst.msk [vmem:[%s3741_s6 + $0x198] sm:$0xff] %vm827_vm1, %v1903_v24  ;;  %2520 = vrsqrt.f32 %v1779_v21  ;;  %v4080_v24 = vld [vmem:[#allocation4_spill] sm:$0xff] }
 0x2c2   : > { %v2509_v29 = vpop.eup %2508  ;;  %1966 = vst.msk [vmem:[%s3741_s6 + $0x190] sm:$0xff] %vm827_vm1, %v1902_v34  ;;  %2522 = vrsqrt.f32 %v1778_v49 }
 0x2c3   : > { %v2511_v40 = vpop.eup %2510  ;;  %v1873_v60 = vmul.f32 %v2509_v29, %v3593_v38  ;;  %v4081_v29 = vld [vmem:[#allocation5_spill] sm:$0xff] }
 0x2c4   : > { %v1872_v26 = vmul.f32 %v2511_v40, %v3595_v59 }
 0x2c5   : > { %1937 = vst.msk [vmem:[%s3741_s6 + $0xa8] sm:$0xff] %vm827_vm1, %v1873_v60 }
 0x2c6   : > { %v2513_v62 = vpop.eup %2512  ;;  %1936 = vst.msk [vmem:[%s3741_s6 + $0xa0] sm:$0xff] %vm827_vm1, %v1872_v26 }
 0x2c7   : > { %v2515_v45 = vpop.eup %2514  ;;  %v1905_v13 = vmul.f32 %v2513_v62, %v3604_v2 }
 0x2c8   : > { %v1904_v46 = vmul.f32 %v2515_v45, %v3606_v9 }
 0x2c9   : > { %1969 = vst.msk [vmem:[%s3741_s6 + $0x1a8] sm:$0xff] %vm827_vm1, %v1905_v13  ;;  %v1609_v38 = vpop.xlane.xlu1 %1608 }
 0x2ca   : > { %v2517_v54 = vpop.eup %2516  ;;  %1968 = vst.msk [vmem:[%s3741_s6 + $0x1a0] sm:$0xff] %vm827_vm1, %v1904_v46  ;;  %v1606_v14 = vpop.xlane.xlu0 %1605  ;;  %v1749_v22 = vmax.f32 %v1609_v38, 1e-24 }
 0x2cb   : > { %v2519_v59 = vpop.eup %2518  ;;  %v1875_v17 = vmul.f32 %v2517_v54, %v3620_v36  ;;  %v1748_v27 = vmax.f32 %v1606_v14, 1e-24 }
 0x2cc   : > { %v1874_v11 = vmul.f32 %v2519_v59, %v3622_v5  ;;  %2524 = vrsqrt.f32 %v1749_v22 }
 0x2cd   : > { %1939 = vst.msk [vmem:[%s3741_s6 + $0xb8] sm:$0xff] %vm827_vm1, %v1875_v17  ;;  %2526 = vrsqrt.f32 %v1748_v27  ;;  %v1705_v9 = vpop.xlane.xlu1 %1704 }
 0x2ce   : > { %v2521_v2 = vpop.eup %2520  ;;  %1938 = vst.msk [vmem:[%s3741_s6 + $0xb0] sm:$0xff] %vm827_vm1, %v1874_v11  ;;  %v1702_v55 = vpop.xlane.xlu0 %1701  ;;  %v1781_v36 = vmax.f32 %v1705_v9, 1e-24  ;;  %v4082_v11 = vld [vmem:[#allocation6_spill] sm:$0xff]  ;;  %v4083_v9 = vld [vmem:[#allocation7_spill] sm:$0xff] }
 0x2cf   : > { %v2523_v37 = vpop.eup %2522  ;;  %v1907_v19 = vmul.f32 %v2521_v2, %v3632_v16  ;;  %v1780_v35 = vmax.f32 %v1702_v55, 1e-24 }
 0x2d0   : > { %v1906_v48 = vmul.f32 %v2523_v37, %v3634_v50  ;;  %2528 = vrsqrt.f32 %v1781_v36 }
 0x2d1   : > { %1971 = vst.msk [vmem:[%s3741_s6 + $0x1b8] sm:$0xff] %vm827_vm1, %v1907_v19  ;;  %2530 = vrsqrt.f32 %v1780_v35 }
 0x2d2   : > { %1970 = vst.msk [vmem:[%s3741_s6 + $0x1b0] sm:$0xff] %vm827_vm1, %v1906_v48 }
 0x2d9   : > { %v2525_v5 = vpop.eup %2524  ;;  %v1615_v39 = vpop.xlane.xlu1 %1614 }
 0x2da   : > { %v1612_v47 = vpop.xlane.xlu0 %1611  ;;  %v2527_v18 = vpop.eup %2526  ;;  %v1877_v6 = vmul.f32 %v2525_v5, %v3646_v58  ;;  %v1751_v16 = vmax.f32 %v1615_v39, 1e-24 }
 0x2db   : > { %v1750_v53 = vmax.f32 %v1612_v47, 1e-24  ;;  %v1876_v4 = vmul.f32 %v2527_v18, %v3648_v44 }
 0x2dc   : > { %1941 = vst.msk [vmem:[%s3741_s6 + $0xc8] sm:$0xff] %vm827_vm1, %v1877_v6  ;;  %2532 = vrsqrt.f32 %v1751_v16 }
 0x2dd   : > { %v2529_v50 = vpop.eup %2528  ;;  %1940 = vst.msk [vmem:[%s3741_s6 + $0xc0] sm:$0xff] %vm827_vm1, %v1876_v4  ;;  %2534 = vrsqrt.f32 %v1750_v53  ;;  %v1711_v25 = vpop.xlane.xlu1 %1710 }
 0x2de   : > { %v1708_v23 = vpop.xlane.xlu0 %1707  ;;  %v2531_v61 = vpop.eup %2530  ;;  %v1909_v57 = vmul.f32 %v2529_v50, %v3656_v51  ;;  %v1783_v58 = vmax.f32 %v1711_v25, 1e-24 }
 0x2df   : > { %v1782_v43 = vmax.f32 %v1708_v23, 1e-24  ;;  %v1908_v56 = vmul.f32 %v2531_v61, %v3658_v30 }
 0x2e0   : > { %1973 = vst.msk [vmem:[%s3741_s6 + $0x1c8] sm:$0xff] %vm827_vm1, %v1909_v57  ;;  %2536 = vrsqrt.f32 %v1783_v58 }
 0x2e1   : > { %1972 = vst.msk [vmem:[%s3741_s6 + $0x1c0] sm:$0xff] %vm827_vm1, %v1908_v56  ;;  %2538 = vrsqrt.f32 %v1782_v43 }
 0x2e9   : > { %v2533_v44 = vpop.eup %2532  ;;  %v1621_v63 = vpop.xlane.xlu1 %1620 }
 0x2ea   : > { %v1618_v0 = vpop.xlane.xlu0 %1617  ;;  %v2535_v10 = vpop.eup %2534  ;;  %v1879_v52 = vmul.f32 %v2533_v44, %v4078_v20  ;;  %v1753_v51 = vmax.f32 %v1621_v63, 1e-24 }
 0x2eb   : > { %v1752_v31 = vmax.f32 %v1618_v0, 1e-24  ;;  %v1878_v15 = vmul.f32 %v2535_v10, %v4079_v7 }
 0x2ec   : > { %1943 = vst.msk [vmem:[%s3741_s6 + $0xd8] sm:$0xff] %vm827_vm1, %v1879_v52  ;;  %2540 = vrsqrt.f32 %v1753_v51 }
 0x2ed   : > { %v2537_v30 = vpop.eup %2536  ;;  %1942 = vst.msk [vmem:[%s3741_s6 + $0xd0] sm:$0xff] %vm827_vm1, %v1878_v15  ;;  %2542 = vrsqrt.f32 %v1752_v31  ;;  %v1717_v42 = vpop.xlane.xlu1 %1716 }
 0x2ee   : > { %v1714_v32 = vpop.xlane.xlu0 %1713  ;;  %v2539_v28 = vpop.eup %2538  ;;  %v1911_v21 = vmul.f32 %v2537_v30, %v4080_v24  ;;  %v1785_v49 = vmax.f32 %v1717_v42, 1e-24 }
 0x2ef   : > { %v1784_v34 = vmax.f32 %v1714_v32, 1e-24  ;;  %v1910_v40 = vmul.f32 %v2539_v28, %v4081_v29 }
 0x2f0   : > { %1975 = vst.msk [vmem:[%s3741_s6 + $0x1d8] sm:$0xff] %vm827_vm1, %v1911_v21  ;;  %2544 = vrsqrt.f32 %v1785_v49 }
 0x2f1   : > { %1974 = vst.msk [vmem:[%s3741_s6 + $0x1d0] sm:$0xff] %vm827_vm1, %v1910_v40  ;;  %2546 = vrsqrt.f32 %v1784_v34 }
 0x2f9   : > { %v1627_v60 = vpop.xlane.xlu1 %1626  ;;  %v2541_v26 = vpop.eup %2540 }
 0x2fa   : > { %v1755_v62 = vmax.f32 %v1627_v60, 1e-24  ;;  %v1624_v45 = vpop.xlane.xlu0 %1623  ;;  %v2543_v13 = vpop.eup %2542  ;;  %v1881_v46 = vmul.f32 %v2541_v26, %v3694_v1 }
 0x2fb   : > { %v1754_v54 = vmax.f32 %v1624_v45, 1e-24  ;;  %v1880_v38 = vmul.f32 %v2543_v13, %v3696_v41 }
 0x2fc   : > { %2548 = vrsqrt.f32 %v1755_v62  ;;  %1945 = vst.msk [vmem:[%s3741_s6 + $0xe8] sm:$0xff] %vm827_vm1, %v1881_v46 }
 0x2fd   : > { %2550 = vrsqrt.f32 %v1754_v54  ;;  %v1723_v14 = vpop.xlane.xlu1 %1722  ;;  %v2545_v59 = vpop.eup %2544  ;;  %1944 = vst.msk [vmem:[%s3741_s6 + $0xe0] sm:$0xff] %vm827_vm1, %v1880_v38 }
 0x2fe   : > { %v1787_v17 = vmax.f32 %v1723_v14, 1e-24  ;;  %v1720_v22 = vpop.xlane.xlu0 %1719  ;;  %v2547_v27 = vpop.eup %2546  ;;  %v1913_v1 = vmul.f32 %v2545_v59, %v4082_v11 }
 0x2ff   : > { %v1786_v2 = vmax.f32 %v1720_v22, 1e-24  ;;  %v1912_v41 = vmul.f32 %v2547_v27, %v4083_v9 }
 0x300   : > { %2552 = vrsqrt.f32 %v1787_v17  ;;  %1977 = vst.msk [vmem:[%s3741_s6 + $0x1e8] sm:$0xff] %vm827_vm1, %v1913_v1 }
 0x301   : > { %2554 = vrsqrt.f32 %v1786_v2  ;;  %1976 = vst.msk [vmem:[%s3741_s6 + $0x1e0] sm:$0xff] %vm827_vm1, %v1912_v41 }
 0x309   : > { %v2549_v55 = vpop.eup %2548 }
 0x30a   : > { %v2551_v37 = vpop.eup %2550  ;;  %v1883_v19 = vmul.f32 %v2549_v55, %v3718_v33 }
 0x30b   : > { %v1882_v36 = vmul.f32 %v2551_v37, %v3720_v3 }
 0x30c   : > { %1947 = vst.msk [vmem:[%s3741_s6 + $0xf8] sm:$0xff] %vm827_vm1, %v1883_v19 }
 0x30d   : > { %v2553_v35 = vpop.eup %2552  ;;  %1946 = vst.msk [vmem:[%s3741_s6 + $0xf0] sm:$0xff] %vm827_vm1, %v1882_v36 }
 0x30e   : > { %v2555_v48 = vpop.eup %2554  ;;  %v1915_v5 = vmul.f32 %v2553_v35, %v3728_v8 }
 0x30f   : > { %v1914_v39 = vmul.f32 %v2555_v48, %v3731_v12 }
 0x310   : > { %1979 = vst.msk [vmem:[%s3741_s6 + $0x1f8] sm:$0xff] %vm827_vm1, %v1915_v5 }
 0x311   : > { %1978 = vst.msk [vmem:[%s3741_s6 + $0x1f0] sm:$0xff] %vm827_vm1, %v1914_v39 }
 0x312 PF: > { %s13_s12 = sadd.s32 1, %s2563_s12  }
 0x313   : > { %p10_p4 = scmp.ge.s32.totalorder %s13_s12, 4  }
 0x315   :  { %12 = sbr.rel (!%p10_p4) target bundleno = 1 (0x1), region = 62 }

</bundles_post_ra>
